<compile_context>
chip_gen: v5e
topology: v5e:2x2
jax: 0.10.0
libtpu: 0.0.40
codegen_flags: <defaults>
</compile_context>

<pallas_src>
import math
import functools

import jax
import jax.numpy as jnp
import numpy as np
from jax import lax
from jax.experimental import pallas as pl
from jax.experimental.pallas import tpu as pltpu


_VMEM_LIMIT_BYTES = 32 * 1024 * 1024    # explicit scoped-VMEM cap (safe on v5e/v6e/v7x)
_BLOCK_VMEM_BUDGET = 12 * 1024 * 1024   # target for the double-buffered blocked I/O


def _choose_batch_block(batch, per_batch_bytes, budget_bytes):
    """Largest divisor of `batch` fitting the VMEM budget, keeping >=2 grid steps
    (so both v7x TensorCores get work) whenever batch >= 2."""
    best = 1
    for cand in range(1, batch + 1):
        if batch % cand != 0:
            continue
        if batch >= 2 and batch // cand < 2:
            continue
        if cand * per_batch_bytes <= budget_bytes:
            best = cand
    return best


# ----------------------------- pass 1 ----------------------------------------

def _mean_corr_kernel(q_ref, k_ref, s_ref, *, L, bblk, nbits):
    """Per-batch wrap-diagonal sums of G = q @ k^T.

    q_ref / k_ref : (bblk, L, C) bf16 VMEM blocks.
    s_ref         : (bblk, 1, L) f32;  s_ref[b,0,m] = sum_t G[t, (m+t) % L],
                    i.e. the (un-scaled) correlation for delay n = (L - m) % L.
    """
    # Row index, shared by all bblk batches of this grid step (one cheap iota pass).
    row = lax.broadcasted_iota(jnp.int32, (L, L), 0)

    for bb in range(bblk):
        # G[t, s] = sum_c q[t, c] * k[s, c]  -- single MXU matmul, bf16 in / f32 acc.
        g = lax.dot_general(q_ref[bb], k_ref[bb], (((1,), (1,)), ((), ())),
                            preferred_element_type=jnp.float32)        # (L, L) f32

        # Left-roll row t by t so wrap-diagonals line up as columns:
        #   g[t, m] <- G[t, (m + t) % L]
        # done with O(log2 L) constant lane rolls gated by the row-index bits
        # (no per-delay loop, no modulo arithmetic).
        for b in range(nbits):
            amt = 1 << b
            g = jnp.where((row & amt) != 0, jnp.roll(g, -amt, axis=1), g)

        # One sublane reduction: column m == delay n = (L - m) % L.
        s_ref[bb] = jnp.sum(g, axis=0, keepdims=True)                  # (1, L)


# ----------------------------- pass 2 ----------------------------------------

def _time_delay_agg_kernel(idx_ref, w_ref, v_ref, o_ref, vv_ref, *, L, bblk, top_k):
    """out[b, t, :] = sum_i w[b, i] * v[b, (t + idx[i]) % L, :].

    idx_ref : (top_k,)    int32 SMEM.
    w_ref   : (B*top_k,)  f32 SMEM (flattened -> no 2D SMEM lane padding).
    v_ref / o_ref : (bblk, L, C2) f32 VMEM blocks.
    vv_ref  : (2L, C2) f32 VMEM scratch (doubled values -> circular shift is a slice).
    """
    step = pl.program_id(0)
    for bb in range(bblk):
        vb = v_ref[bb]                                   # (L, C2) f32
        vv_ref[pl.ds(0, L), :] = vb
        vv_ref[pl.ds(L, L), :] = vb

        gb = step * bblk + bb                            # global batch index
        acc = jnp.zeros_like(vb)
        for i in range(top_k):                           # top_k ~ factor*log(L): tiny, static
            d = idx_ref[i]                               # delay (SMEM scalar)
            w = w_ref[gb * top_k + i]                    # softmax weight (SMEM scalar)
            acc = acc + w * vv_ref[pl.ds(d, L), :]       # shifted pattern accumulate
        o_ref[bb] = acc.astype(o_ref.dtype)


# ----------------------------- wrapper ---------------------------------------

def autocorrelation_forward(queries, keys, values, *, factor=1):
    """AutoCorrelation.forward (training branch, output_attention=False).

    queries: (B, L, H, E), keys: (B, S, H, E), values: (B, S, H, D)
    returns (V, None) with V: (B, L, H, D) float32.
    """
    B, L, H, E = queries.shape
    _, S, _, D = values.shape
    if L > S:
        values = jnp.concatenate(
            [values, jnp.zeros((B, L - S, H, D), values.dtype)], axis=1)
        keys = jnp.concatenate(
            [keys, jnp.zeros((B, L - S, H, E), keys.dtype)], axis=1)
    else:
        values = values[:, :L]
        keys = keys[:, :L]

    C = H * E
    C2 = H * D
    # Free reshapes: channels stay on the lane (last) axis -> no transposes.
    # q/k only feed the MXU -> store as bf16 (halves pass-1 HBM traffic; f32
    # accumulation keeps top-k / softmax stable).  v stays f32 (pass 2 is VPU only).
    q = queries.reshape(B, L, C).astype(jnp.bfloat16)
    k = keys.reshape(B, L, C).astype(jnp.bfloat16)
    v = values.reshape(B, L, C2).astype(jnp.float32)

    top_k = max(1, int(factor * math.log(L)))
    nbits = max(1, (L - 1).bit_length())

    per_batch_bytes = max(8 * L * C,       # pass 1: q + k bf16, double-buffered
                          16 * L * C2)     # pass 2: v in + out f32, double-buffered
    bblk = _choose_batch_block(B, per_batch_bytes, _BLOCK_VMEM_BUDGET)
    grid = (B // bblk,)

    # ---- pass 1: per-batch mean correlation ---------------------------------
    col_sum = pl.pallas_call(
        functools.partial(_mean_corr_kernel, L=L, bblk=bblk, nbits=nbits),
        grid=grid,
        in_specs=[pl.BlockSpec((bblk, L, C), lambda i: (i, 0, 0)),
                  pl.BlockSpec((bblk, L, C), lambda i: (i, 0, 0))],
        out_specs=pl.BlockSpec((bblk, 1, L), lambda i: (i, 0, 0)),
        out_shape=jax.ShapeDtypeStruct((B, 1, L), jnp.float32),
        compiler_params=pltpu.CompilerParams(
            dimension_semantics=("parallel",),
            vmem_limit_bytes=_VMEM_LIMIT_BYTES),
    )(q, k)[:, 0, :]                                                   # (B, L)

    # Column m holds delay n = (L - m) % L; rescale by 1/(H*E) (the torch double mean).
    reindex = jnp.asarray((L - np.arange(L)) % L, dtype=jnp.int32)
    mean_value = jnp.take(col_sum, reindex, axis=1) * (1.0 / C)        # (B, L)

    # ---- tiny cross-batch glue on (B, L): top-k delays + softmax weights ----
    _, index = lax.top_k(jnp.mean(mean_value, axis=0), top_k)          # (top_k,)
    weights = jnp.take(mean_value, index, axis=1)                      # (B, top_k)
    tmp_corr = jax.nn.softmax(weights, axis=-1)                        # (B, top_k)

    # ---- pass 2: aggregation over the top_k delays only ---------------------
    out = pl.pallas_call(
        functools.partial(_time_delay_agg_kernel, L=L, bblk=bblk, top_k=top_k),
        grid=grid,
        in_specs=[pl.BlockSpec(memory_space=pltpu.MemorySpace.SMEM),   # index
                  pl.BlockSpec(memory_space=pltpu.MemorySpace.SMEM),   # weights (flat)
                  pl.BlockSpec((bblk, L, C2), lambda i: (i, 0, 0))],   # v
        out_specs=pl.BlockSpec((bblk, L, C2), lambda i: (i, 0, 0)),
        out_shape=jax.ShapeDtypeStruct((B, L, C2), jnp.float32),
        scratch_shapes=[pltpu.VMEM((2 * L, C2), jnp.float32)],
        compiler_params=pltpu.CompilerParams(
            dimension_semantics=("parallel",),
            vmem_limit_bytes=_VMEM_LIMIT_BYTES),
    )(index.astype(jnp.int32), tmp_corr.reshape(-1).astype(jnp.float32), v)

    V = out.reshape(B, L, H, D)
    return V, None


# ----------------------------- reference & test -------------------------------

def _reference_forward(queries, keys, values, factor=1):
    """Pure-JAX FFT-based reference (mirrors the PyTorch training branch)."""
    B, L, H, E = queries.shape
    values = values[:, :L]
    keys = keys[:, :L]
    q = jnp.transpose(queries, (0, 2, 3, 1))
    k = jnp.transpose(keys, (0, 2, 3, 1))
    v = jnp.transpose(values, (0, 2, 3, 1))
    corr = jnp.fft.irfft(jnp.fft.rfft(q, axis=-1) * jnp.conj(jnp.fft.rfft(k, axis=-1)),
                         n=L, axis=-1)
    top_k = max(1, int(factor * math.log(L)))
    mean_value = jnp.mean(jnp.mean(corr, axis=1), axis=1)              # (B, L)
    index = lax.top_k(jnp.mean(mean_value, axis=0), top_k)[1]
    weights = jnp.stack([mean_value[:, index[i]] for i in range(top_k)], axis=-1)
    tmp_corr = jax.nn.softmax(weights, axis=-1)
    agg = jnp.zeros_like(v)
    for i in range(top_k):
        pattern = jnp.roll(v, -int(index[i]), axis=-1)
        agg = agg + pattern * tmp_corr[:, i][:, None, None, None]
    return jnp.transpose(agg, (0, 3, 1, 2))


if __name__ == "__main__":
    key = jax.random.PRNGKey(0)
    B, L, H, E, D = 4, 64, 4, 8, 8
    kq, kk, kv = jax.random.split(key, 3)

    # Periodic series + small noise: representative input for an AutoCorrelation
    # block, and it keeps the top-k delay selection well separated so the bf16
    # MXU operands cannot flip an index against the f32 FFT reference.
    t = jnp.arange(L, dtype=jnp.float32)
    season = jnp.sin(2.0 * jnp.pi * t / 16.0)[None, :, None, None]     # period 16
    queries = season + 0.1 * jax.random.normal(kq, (B, L, H, E), dtype=jnp.float32)
    keys_ = season + 0.1 * jax.random.normal(kk, (B, L, H, E), dtype=jnp.float32)
    values = jax.random.normal(kv, (B, L, H, D), dtype=jnp.float32)

    fwd = jax.jit(lambda q, k, v: autocorrelation_forward(q, k, v, factor=1))
    V, attn = fwd(queries, keys_, values)
    V = jax.block_until_ready(V)
    assert V.shape == (B, L, H, D) and attn is None

    V_ref = _reference_forward(queries, keys_, values, factor=1)
    # Tolerance loosened vs the pure-f32 version because pass-1 feeds the MXU
    # bf16 operands (per the perf review); the aggregation itself stays f32.
    np.testing.assert_allclose(np.asarray(V), np.asarray(V_ref), rtol=2e-2, atol=2e-2)

    print("KERNEL_OK")
</pallas_src>

<mosaic_0001>
module attributes {stable_mosaic.version = 11 : i64} {
  func.func @_mean_corr_kernel(%arg0: i32, %arg1: memref<2x64x32xbf16, #tpu.memory_space<vmem>>, %arg2: memref<2x64x32xbf16, #tpu.memory_space<vmem>>, %arg3: memref<2x1x64xf32, #tpu.memory_space<vmem>>) attributes {dimension_semantics = [#tpu.dimension_semantics<parallel>], iteration_bounds = array<i64: 2>, scalar_prefetch = 0 : i64, scratch_operands = 0 : i64, tpu.core_type = #tpu.core_type<tc>, window_params = [{transform_indices = @transform_0, window_bounds = array<i64: 2, 64, 32>}, {transform_indices = @transform_1, window_bounds = array<i64: 2, 64, 32>}, {transform_indices = @transform_2, window_bounds = array<i64: 2, 1, 64>}]} {
    %0 = tpu.iota {dimensions = array<i32: 0>} : vector<64x64xi32>
    %c0 = arith.constant 0 : index
    %c0_0 = arith.constant 0 : index
    %c0_1 = arith.constant 0 : index
    %1 = vector.load %arg1[%c0, %c0_0, %c0_1] : memref<2x64x32xbf16, #tpu.memory_space<vmem>>, vector<1x64x32xbf16>
    %2 = vector.shape_cast %1 : vector<1x64x32xbf16> to vector<64x32xbf16>
    %c0_2 = arith.constant 0 : index
    %c0_3 = arith.constant 0 : index
    %c0_4 = arith.constant 0 : index
    %3 = vector.load %arg2[%c0_2, %c0_3, %c0_4] : memref<2x64x32xbf16, #tpu.memory_space<vmem>>, vector<1x64x32xbf16>
    %4 = vector.shape_cast %3 : vector<1x64x32xbf16> to vector<64x32xbf16>
    %cst = arith.constant dense<0.000000e+00> : vector<64x64xf32>
    %5 = tpu.matmul %2, %4, %cst {dimension_numbers = #tpu.dot_dimension_numbers<[1], [1], [0], [0], [0, 0, 1, 0], [], []>} : vector<64x32xbf16>, vector<64x32xbf16>, vector<64x64xf32> -> vector<64x64xf32>
    %c1_i32 = arith.constant 1 : i32
    %6 = vector.broadcast %c1_i32 : i32 to vector<64x64xi32>
    %7 = arith.andi %0, %6 : vector<64x64xi32>
    %c0_i32 = arith.constant 0 : i32
    %8 = vector.broadcast %c0_i32 : i32 to vector<64x64xi32>
    %9 = arith.cmpi ne, %7, %8 : vector<64x64xi32>
    %10 = vector.extract_strided_slice %5 {offsets = [0, 1], sizes = [64, 63], strides = [1, 1]} : vector<64x64xf32> to vector<64x63xf32>
    %11 = vector.extract_strided_slice %5 {offsets = [0, 0], sizes = [64, 1], strides = [1, 1]} : vector<64x64xf32> to vector<64x1xf32>
    %12 = tpu.concatenate %10, %11 in 1 : vector<64x63xf32>, vector<64x1xf32> -> vector<64x64xf32>
    %13 = arith.select %9, %12, %5 : vector<64x64xi1>, vector<64x64xf32>
    %c2_i32 = arith.constant 2 : i32
    %14 = vector.broadcast %c2_i32 : i32 to vector<64x64xi32>
    %15 = arith.andi %0, %14 : vector<64x64xi32>
    %c0_i32_5 = arith.constant 0 : i32
    %16 = vector.broadcast %c0_i32_5 : i32 to vector<64x64xi32>
    %17 = arith.cmpi ne, %15, %16 : vector<64x64xi32>
    %18 = vector.extract_strided_slice %13 {offsets = [0, 2], sizes = [64, 62], strides = [1, 1]} : vector<64x64xf32> to vector<64x62xf32>
    %19 = vector.extract_strided_slice %13 {offsets = [0, 0], sizes = [64, 2], strides = [1, 1]} : vector<64x64xf32> to vector<64x2xf32>
    %20 = tpu.concatenate %18, %19 in 1 : vector<64x62xf32>, vector<64x2xf32> -> vector<64x64xf32>
    %21 = arith.select %17, %20, %13 : vector<64x64xi1>, vector<64x64xf32>
    %c4_i32 = arith.constant 4 : i32
    %22 = vector.broadcast %c4_i32 : i32 to vector<64x64xi32>
    %23 = arith.andi %0, %22 : vector<64x64xi32>
    %c0_i32_6 = arith.constant 0 : i32
    %24 = vector.broadcast %c0_i32_6 : i32 to vector<64x64xi32>
    %25 = arith.cmpi ne, %23, %24 : vector<64x64xi32>
    %26 = vector.extract_strided_slice %21 {offsets = [0, 4], sizes = [64, 60], strides = [1, 1]} : vector<64x64xf32> to vector<64x60xf32>
    %27 = vector.extract_strided_slice %21 {offsets = [0, 0], sizes = [64, 4], strides = [1, 1]} : vector<64x64xf32> to vector<64x4xf32>
    %28 = tpu.concatenate %26, %27 in 1 : vector<64x60xf32>, vector<64x4xf32> -> vector<64x64xf32>
    %29 = arith.select %25, %28, %21 : vector<64x64xi1>, vector<64x64xf32>
    %c8_i32 = arith.constant 8 : i32
    %30 = vector.broadcast %c8_i32 : i32 to vector<64x64xi32>
    %31 = arith.andi %0, %30 : vector<64x64xi32>
    %c0_i32_7 = arith.constant 0 : i32
    %32 = vector.broadcast %c0_i32_7 : i32 to vector<64x64xi32>
    %33 = arith.cmpi ne, %31, %32 : vector<64x64xi32>
    %34 = vector.extract_strided_slice %29 {offsets = [0, 8], sizes = [64, 56], strides = [1, 1]} : vector<64x64xf32> to vector<64x56xf32>
    %35 = vector.extract_strided_slice %29 {offsets = [0, 0], sizes = [64, 8], strides = [1, 1]} : vector<64x64xf32> to vector<64x8xf32>
    %36 = tpu.concatenate %34, %35 in 1 : vector<64x56xf32>, vector<64x8xf32> -> vector<64x64xf32>
    %37 = arith.select %33, %36, %29 : vector<64x64xi1>, vector<64x64xf32>
    %c16_i32 = arith.constant 16 : i32
    %38 = vector.broadcast %c16_i32 : i32 to vector<64x64xi32>
    %39 = arith.andi %0, %38 : vector<64x64xi32>
    %c0_i32_8 = arith.constant 0 : i32
    %40 = vector.broadcast %c0_i32_8 : i32 to vector<64x64xi32>
    %41 = arith.cmpi ne, %39, %40 : vector<64x64xi32>
    %42 = vector.extract_strided_slice %37 {offsets = [0, 16], sizes = [64, 48], strides = [1, 1]} : vector<64x64xf32> to vector<64x48xf32>
    %43 = vector.extract_strided_slice %37 {offsets = [0, 0], sizes = [64, 16], strides = [1, 1]} : vector<64x64xf32> to vector<64x16xf32>
    %44 = tpu.concatenate %42, %43 in 1 : vector<64x48xf32>, vector<64x16xf32> -> vector<64x64xf32>
    %45 = arith.select %41, %44, %37 : vector<64x64xi1>, vector<64x64xf32>
    %c32_i32 = arith.constant 32 : i32
    %46 = vector.broadcast %c32_i32 : i32 to vector<64x64xi32>
    %47 = arith.andi %0, %46 : vector<64x64xi32>
    %c0_i32_9 = arith.constant 0 : i32
    %48 = vector.broadcast %c0_i32_9 : i32 to vector<64x64xi32>
    %49 = arith.cmpi ne, %47, %48 : vector<64x64xi32>
    %50 = vector.extract_strided_slice %45 {offsets = [0, 32], sizes = [64, 32], strides = [1, 1]} : vector<64x64xf32> to vector<64x32xf32>
    %51 = vector.extract_strided_slice %45 {offsets = [0, 0], sizes = [64, 32], strides = [1, 1]} : vector<64x64xf32> to vector<64x32xf32>
    %52 = tpu.concatenate %50, %51 in 1 : vector<64x32xf32>, vector<64x32xf32> -> vector<64x64xf32>
    %53 = arith.select %49, %52, %45 : vector<64x64xi1>, vector<64x64xf32>
    %cst_10 = arith.constant dense<0.000000e+00> : vector<64xf32>
    %54 = vector.multi_reduction <add>, %53, %cst_10 [0] : vector<64x64xf32> to vector<64xf32>
    %55 = vector.shape_cast %54 : vector<64xf32> to vector<1x64xf32>
    %c0_11 = arith.constant 0 : index
    %c0_12 = arith.constant 0 : index
    %c0_13 = arith.constant 0 : index
    %56 = vector.load %arg3[%c0_11, %c0_12, %c0_13] : memref<2x1x64xf32, #tpu.memory_space<vmem>>, vector<1x1x64xf32>
    %57 = vector.shape_cast %56 : vector<1x1x64xf32> to vector<1x64xf32>
    %58 = vector.shape_cast %55 : vector<1x64xf32> to vector<1x1x64xf32>
    tpu.vector_store %arg3[%c0_11, %c0_12, %c0_13], %58 {strides = array<i32>} : memref<2x1x64xf32, #tpu.memory_space<vmem>>, vector<1x1x64xf32>,
    %c1 = arith.constant 1 : index
    %c0_14 = arith.constant 0 : index
    %c0_15 = arith.constant 0 : index
    %59 = vector.load %arg1[%c1, %c0_14, %c0_15] : memref<2x64x32xbf16, #tpu.memory_space<vmem>>, vector<1x64x32xbf16>
    %60 = vector.shape_cast %59 : vector<1x64x32xbf16> to vector<64x32xbf16>
    %c1_16 = arith.constant 1 : index
    %c0_17 = arith.constant 0 : index
    %c0_18 = arith.constant 0 : index
    %61 = vector.load %arg2[%c1_16, %c0_17, %c0_18] : memref<2x64x32xbf16, #tpu.memory_space<vmem>>, vector<1x64x32xbf16>
    %62 = vector.shape_cast %61 : vector<1x64x32xbf16> to vector<64x32xbf16>
    %cst_19 = arith.constant dense<0.000000e+00> : vector<64x64xf32>
    %63 = tpu.matmul %60, %62, %cst_19 {dimension_numbers = #tpu.dot_dimension_numbers<[1], [1], [0], [0], [0, 0, 1, 0], [], []>} : vector<64x32xbf16>, vector<64x32xbf16>, vector<64x64xf32> -> vector<64x64xf32>
    %c1_i32_20 = arith.constant 1 : i32
    %64 = vector.broadcast %c1_i32_20 : i32 to vector<64x64xi32>
    %65 = arith.andi %0, %64 : vector<64x64xi32>
    %c0_i32_21 = arith.constant 0 : i32
    %66 = vector.broadcast %c0_i32_21 : i32 to vector<64x64xi32>
    %67 = arith.cmpi ne, %65, %66 : vector<64x64xi32>
    %68 = vector.extract_strided_slice %63 {offsets = [0, 1], sizes = [64, 63], strides = [1, 1]} : vector<64x64xf32> to vector<64x63xf32>
    %69 = vector.extract_strided_slice %63 {offsets = [0, 0], sizes = [64, 1], strides = [1, 1]} : vector<64x64xf32> to vector<64x1xf32>
    %70 = tpu.concatenate %68, %69 in 1 : vector<64x63xf32>, vector<64x1xf32> -> vector<64x64xf32>
    %71 = arith.select %67, %70, %63 : vector<64x64xi1>, vector<64x64xf32>
    %c2_i32_22 = arith.constant 2 : i32
    %72 = vector.broadcast %c2_i32_22 : i32 to vector<64x64xi32>
    %73 = arith.andi %0, %72 : vector<64x64xi32>
    %c0_i32_23 = arith.constant 0 : i32
    %74 = vector.broadcast %c0_i32_23 : i32 to vector<64x64xi32>
    %75 = arith.cmpi ne, %73, %74 : vector<64x64xi32>
    %76 = vector.extract_strided_slice %71 {offsets = [0, 2], sizes = [64, 62], strides = [1, 1]} : vector<64x64xf32> to vector<64x62xf32>
    %77 = vector.extract_strided_slice %71 {offsets = [0, 0], sizes = [64, 2], strides = [1, 1]} : vector<64x64xf32> to vector<64x2xf32>
    %78 = tpu.concatenate %76, %77 in 1 : vector<64x62xf32>, vector<64x2xf32> -> vector<64x64xf32>
    %79 = arith.select %75, %78, %71 : vector<64x64xi1>, vector<64x64xf32>
    %c4_i32_24 = arith.constant 4 : i32
    %80 = vector.broadcast %c4_i32_24 : i32 to vector<64x64xi32>
    %81 = arith.andi %0, %80 : vector<64x64xi32>
    %c0_i32_25 = arith.constant 0 : i32
    %82 = vector.broadcast %c0_i32_25 : i32 to vector<64x64xi32>
    %83 = arith.cmpi ne, %81, %82 : vector<64x64xi32>
    %84 = vector.extract_strided_slice %79 {offsets = [0, 4], sizes = [64, 60], strides = [1, 1]} : vector<64x64xf32> to vector<64x60xf32>
    %85 = vector.extract_strided_slice %79 {offsets = [0, 0], sizes = [64, 4], strides = [1, 1]} : vector<64x64xf32> to vector<64x4xf32>
    %86 = tpu.concatenate %84, %85 in 1 : vector<64x60xf32>, vector<64x4xf32> -> vector<64x64xf32>
    %87 = arith.select %83, %86, %79 : vector<64x64xi1>, vector<64x64xf32>
    %c8_i32_26 = arith.constant 8 : i32
    %88 = vector.broadcast %c8_i32_26 : i32 to vector<64x64xi32>
    %89 = arith.andi %0, %88 : vector<64x64xi32>
    %c0_i32_27 = arith.constant 0 : i32
    %90 = vector.broadcast %c0_i32_27 : i32 to vector<64x64xi32>
    %91 = arith.cmpi ne, %89, %90 : vector<64x64xi32>
    %92 = vector.extract_strided_slice %87 {offsets = [0, 8], sizes = [64, 56], strides = [1, 1]} : vector<64x64xf32> to vector<64x56xf32>
    %93 = vector.extract_strided_slice %87 {offsets = [0, 0], sizes = [64, 8], strides = [1, 1]} : vector<64x64xf32> to vector<64x8xf32>
    %94 = tpu.concatenate %92, %93 in 1 : vector<64x56xf32>, vector<64x8xf32> -> vector<64x64xf32>
    %95 = arith.select %91, %94, %87 : vector<64x64xi1>, vector<64x64xf32>
    %c16_i32_28 = arith.constant 16 : i32
    %96 = vector.broadcast %c16_i32_28 : i32 to vector<64x64xi32>
    %97 = arith.andi %0, %96 : vector<64x64xi32>
    %c0_i32_29 = arith.constant 0 : i32
    %98 = vector.broadcast %c0_i32_29 : i32 to vector<64x64xi32>
    %99 = arith.cmpi ne, %97, %98 : vector<64x64xi32>
    %100 = vector.extract_strided_slice %95 {offsets = [0, 16], sizes = [64, 48], strides = [1, 1]} : vector<64x64xf32> to vector<64x48xf32>
    %101 = vector.extract_strided_slice %95 {offsets = [0, 0], sizes = [64, 16], strides = [1, 1]} : vector<64x64xf32> to vector<64x16xf32>
    %102 = tpu.concatenate %100, %101 in 1 : vector<64x48xf32>, vector<64x16xf32> -> vector<64x64xf32>
    %103 = arith.select %99, %102, %95 : vector<64x64xi1>, vector<64x64xf32>
    %c32_i32_30 = arith.constant 32 : i32
    %104 = vector.broadcast %c32_i32_30 : i32 to vector<64x64xi32>
    %105 = arith.andi %0, %104 : vector<64x64xi32>
    %c0_i32_31 = arith.constant 0 : i32
    %106 = vector.broadcast %c0_i32_31 : i32 to vector<64x64xi32>
    %107 = arith.cmpi ne, %105, %106 : vector<64x64xi32>
    %108 = vector.extract_strided_slice %103 {offsets = [0, 32], sizes = [64, 32], strides = [1, 1]} : vector<64x64xf32> to vector<64x32xf32>
    %109 = vector.extract_strided_slice %103 {offsets = [0, 0], sizes = [64, 32], strides = [1, 1]} : vector<64x64xf32> to vector<64x32xf32>
    %110 = tpu.concatenate %108, %109 in 1 : vector<64x32xf32>, vector<64x32xf32> -> vector<64x64xf32>
    %111 = arith.select %107, %110, %103 : vector<64x64xi1>, vector<64x64xf32>
    %cst_32 = arith.constant dense<0.000000e+00> : vector<64xf32>
    %112 = vector.multi_reduction <add>, %111, %cst_32 [0] : vector<64x64xf32> to vector<64xf32>
    %113 = vector.shape_cast %112 : vector<64xf32> to vector<1x64xf32>
    %c1_33 = arith.constant 1 : index
    %c0_34 = arith.constant 0 : index
    %c0_35 = arith.constant 0 : index
    %114 = vector.load %arg3[%c1_33, %c0_34, %c0_35] : memref<2x1x64xf32, #tpu.memory_space<vmem>>, vector<1x1x64xf32>
    %115 = vector.shape_cast %114 : vector<1x1x64xf32> to vector<1x64xf32>
    %116 = vector.shape_cast %113 : vector<1x64xf32> to vector<1x1x64xf32>
    tpu.vector_store %arg3[%c1_33, %c0_34, %c0_35], %116 {strides = array<i32>} : memref<2x1x64xf32, #tpu.memory_space<vmem>>, vector<1x1x64xf32>,
    return
  }
  func.func @transform_0(%arg0: i32) -> (i32, i32, i32) {
    %c0_i32 = arith.constant 0 : i32
    %c0_i32_0 = arith.constant 0 : i32
    %c0_i32_1 = arith.constant 0 : i32
    return %arg0, %c0_i32, %c0_i32_0 : i32, i32, i32
  }
  func.func @transform_1(%arg0: i32) -> (i32, i32, i32) {
    %c0_i32 = arith.constant 0 : i32
    %c0_i32_0 = arith.constant 0 : i32
    %c0_i32_1 = arith.constant 0 : i32
    return %arg0, %c0_i32, %c0_i32_0 : i32, i32, i32
  }
  func.func @transform_2(%arg0: i32) -> (i32, i32, i32) {
    %c0_i32 = arith.constant 0 : i32
    %c0_i32_0 = arith.constant 0 : i32
    %c0_i32_1 = arith.constant 0 : i32
    return %arg0, %c0_i32, %c0_i32_0 : i32, i32, i32
  }
}

module attributes {stable_mosaic.version = 11 : i64} {
  func.func @_time_delay_agg_kernel(%arg0: i32, %arg1: memref<4xi32, #tpu.memory_space<smem>>, %arg2: memref<16xf32, #tpu.memory_space<smem>>, %arg3: memref<2x64x32xf32, #tpu.memory_space<vmem>>, %arg4: memref<2x64x32xf32, #tpu.memory_space<vmem>>, %arg5: memref<128x32xf32, #tpu.memory_space<vmem>>) attributes {dimension_semantics = [#tpu.dimension_semantics<parallel>], iteration_bounds = array<i64: 2>, scalar_prefetch = 0 : i64, scratch_operands = 1 : i64, tpu.core_type = #tpu.core_type<tc>, window_params = [{transform_indices = @transform_0, window_bounds = array<i64: 4>}, {transform_indices = @transform_1, window_bounds = array<i64: 16>}, {transform_indices = @transform_2, window_bounds = array<i64: 2, 64, 32>}, {transform_indices = @transform_3, window_bounds = array<i64: 2, 64, 32>}]} {
    %c0 = arith.constant 0 : index
    %c0_0 = arith.constant 0 : index
    %c0_1 = arith.constant 0 : index
    %0 = vector.load %arg3[%c0, %c0_0, %c0_1] : memref<2x64x32xf32, #tpu.memory_space<vmem>>, vector<1x64x32xf32>
    %1 = vector.shape_cast %0 : vector<1x64x32xf32> to vector<64x32xf32>
    %c0_2 = arith.constant 0 : index
    %c0_3 = arith.constant 0 : index
    %2 = vector.load %arg5[%c0_2, %c0_3] : memref<128x32xf32, #tpu.memory_space<vmem>>, vector<64x32xf32>
    tpu.vector_store %arg5[%c0_2, %c0_3], %1 {strides = array<i32>} : memref<128x32xf32, #tpu.memory_space<vmem>>, vector<64x32xf32>,
    %c64 = arith.constant 64 : index
    %c0_4 = arith.constant 0 : index
    %3 = vector.load %arg5[%c64, %c0_4] : memref<128x32xf32, #tpu.memory_space<vmem>>, vector<64x32xf32>
    tpu.vector_store %arg5[%c64, %c0_4], %1 {strides = array<i32>} : memref<128x32xf32, #tpu.memory_space<vmem>>, vector<64x32xf32>,
    %c2_i32 = arith.constant 2 : i32
    %4 = arith.muli %arg0, %c2_i32 : i32
    %c0_i32 = arith.constant 0 : i32
    %5 = arith.addi %4, %c0_i32 : i32
    %cst = arith.constant 0.000000e+00 : f32
    %6 = vector.broadcast %cst : f32 to vector<64x32xf32>
    %c0_5 = arith.constant 0 : index
    %7 = memref.load %arg1[%c0_5] : memref<4xi32, #tpu.memory_space<smem>>
    %c4_i32 = arith.constant 4 : i32
    %8 = arith.muli %5, %c4_i32 : i32
    %c0_i32_6 = arith.constant 0 : i32
    %9 = arith.addi %8, %c0_i32_6 : i32
    %10 = arith.index_cast %9 : i32 to index
    %11 = memref.load %arg2[%10] : memref<16xf32, #tpu.memory_space<smem>>
    %12 = arith.index_cast %7 : i32 to index
    %c0_7 = arith.constant 0 : index
    %13 = vector.load %arg5[%12, %c0_7] : memref<128x32xf32, #tpu.memory_space<vmem>>, vector<64x32xf32>
    %14 = vector.broadcast %11 : f32 to vector<64x32xf32>
    %15 = arith.mulf %14, %13 : vector<64x32xf32>
    %16 = arith.addf %6, %15 : vector<64x32xf32>
    %c1 = arith.constant 1 : index
    %17 = memref.load %arg1[%c1] : memref<4xi32, #tpu.memory_space<smem>>
    %c4_i32_8 = arith.constant 4 : i32
    %18 = arith.muli %5, %c4_i32_8 : i32
    %c1_i32 = arith.constant 1 : i32
    %19 = arith.addi %18, %c1_i32 : i32
    %20 = arith.index_cast %19 : i32 to index
    %21 = memref.load %arg2[%20] : memref<16xf32, #tpu.memory_space<smem>>
    %22 = arith.index_cast %17 : i32 to index
    %c0_9 = arith.constant 0 : index
    %23 = vector.load %arg5[%22, %c0_9] : memref<128x32xf32, #tpu.memory_space<vmem>>, vector<64x32xf32>
    %24 = vector.broadcast %21 : f32 to vector<64x32xf32>
    %25 = arith.mulf %24, %23 : vector<64x32xf32>
    %26 = arith.addf %16, %25 : vector<64x32xf32>
    %c2 = arith.constant 2 : index
    %27 = memref.load %arg1[%c2] : memref<4xi32, #tpu.memory_space<smem>>
    %c4_i32_10 = arith.constant 4 : i32
    %28 = arith.muli %5, %c4_i32_10 : i32
    %c2_i32_11 = arith.constant 2 : i32
    %29 = arith.addi %28, %c2_i32_11 : i32
    %30 = arith.index_cast %29 : i32 to index
    %31 = memref.load %arg2[%30] : memref<16xf32, #tpu.memory_space<smem>>
    %32 = arith.index_cast %27 : i32 to index
    %c0_12 = arith.constant 0 : index
    %33 = vector.load %arg5[%32, %c0_12] : memref<128x32xf32, #tpu.memory_space<vmem>>, vector<64x32xf32>
    %34 = vector.broadcast %31 : f32 to vector<64x32xf32>
    %35 = arith.mulf %34, %33 : vector<64x32xf32>
    %36 = arith.addf %26, %35 : vector<64x32xf32>
    %c3 = arith.constant 3 : index
    %37 = memref.load %arg1[%c3] : memref<4xi32, #tpu.memory_space<smem>>
    %c4_i32_13 = arith.constant 4 : i32
    %38 = arith.muli %5, %c4_i32_13 : i32
    %c3_i32 = arith.constant 3 : i32
    %39 = arith.addi %38, %c3_i32 : i32
    %40 = arith.index_cast %39 : i32 to index
    %41 = memref.load %arg2[%40] : memref<16xf32, #tpu.memory_space<smem>>
    %42 = arith.index_cast %37 : i32 to index
    %c0_14 = arith.constant 0 : index
    %43 = vector.load %arg5[%42, %c0_14] : memref<128x32xf32, #tpu.memory_space<vmem>>, vector<64x32xf32>
    %44 = vector.broadcast %41 : f32 to vector<64x32xf32>
    %45 = arith.mulf %44, %43 : vector<64x32xf32>
    %46 = arith.addf %36, %45 : vector<64x32xf32>
    %c0_15 = arith.constant 0 : index
    %c0_16 = arith.constant 0 : index
    %c0_17 = arith.constant 0 : index
    %47 = vector.load %arg4[%c0_15, %c0_16, %c0_17] : memref<2x64x32xf32, #tpu.memory_space<vmem>>, vector<1x64x32xf32>
    %48 = vector.shape_cast %47 : vector<1x64x32xf32> to vector<64x32xf32>
    %49 = vector.shape_cast %46 : vector<64x32xf32> to vector<1x64x32xf32>
    tpu.vector_store %arg4[%c0_15, %c0_16, %c0_17], %49 {strides = array<i32>} : memref<2x64x32xf32, #tpu.memory_space<vmem>>, vector<1x64x32xf32>,
    %c1_18 = arith.constant 1 : index
    %c0_19 = arith.constant 0 : index
    %c0_20 = arith.constant 0 : index
    %50 = vector.load %arg3[%c1_18, %c0_19, %c0_20] : memref<2x64x32xf32, #tpu.memory_space<vmem>>, vector<1x64x32xf32>
    %51 = vector.shape_cast %50 : vector<1x64x32xf32> to vector<64x32xf32>
    %c0_21 = arith.constant 0 : index
    %c0_22 = arith.constant 0 : index
    %52 = vector.load %arg5[%c0_21, %c0_22] : memref<128x32xf32, #tpu.memory_space<vmem>>, vector<64x32xf32>
    tpu.vector_store %arg5[%c0_21, %c0_22], %51 {strides = array<i32>} : memref<128x32xf32, #tpu.memory_space<vmem>>, vector<64x32xf32>,
    %c64_23 = arith.constant 64 : index
    %c0_24 = arith.constant 0 : index
    %53 = vector.load %arg5[%c64_23, %c0_24] : memref<128x32xf32, #tpu.memory_space<vmem>>, vector<64x32xf32>
    tpu.vector_store %arg5[%c64_23, %c0_24], %51 {strides = array<i32>} : memref<128x32xf32, #tpu.memory_space<vmem>>, vector<64x32xf32>,
    %c2_i32_25 = arith.constant 2 : i32
    %54 = arith.muli %arg0, %c2_i32_25 : i32
    %c1_i32_26 = arith.constant 1 : i32
    %55 = arith.addi %54, %c1_i32_26 : i32
    %cst_27 = arith.constant 0.000000e+00 : f32
    %56 = vector.broadcast %cst_27 : f32 to vector<64x32xf32>
    %c0_28 = arith.constant 0 : index
    %57 = memref.load %arg1[%c0_28] : memref<4xi32, #tpu.memory_space<smem>>
    %c4_i32_29 = arith.constant 4 : i32
    %58 = arith.muli %55, %c4_i32_29 : i32
    %c0_i32_30 = arith.constant 0 : i32
    %59 = arith.addi %58, %c0_i32_30 : i32
    %60 = arith.index_cast %59 : i32 to index
    %61 = memref.load %arg2[%60] : memref<16xf32, #tpu.memory_space<smem>>
    %62 = arith.index_cast %57 : i32 to index
    %c0_31 = arith.constant 0 : index
    %63 = vector.load %arg5[%62, %c0_31] : memref<128x32xf32, #tpu.memory_space<vmem>>, vector<64x32xf32>
    %64 = vector.broadcast %61 : f32 to vector<64x32xf32>
    %65 = arith.mulf %64, %63 : vector<64x32xf32>
    %66 = arith.addf %56, %65 : vector<64x32xf32>
    %c1_32 = arith.constant 1 : index
    %67 = memref.load %arg1[%c1_32] : memref<4xi32, #tpu.memory_space<smem>>
    %c4_i32_33 = arith.constant 4 : i32
    %68 = arith.muli %55, %c4_i32_33 : i32
    %c1_i32_34 = arith.constant 1 : i32
    %69 = arith.addi %68, %c1_i32_34 : i32
    %70 = arith.index_cast %69 : i32 to index
    %71 = memref.load %arg2[%70] : memref<16xf32, #tpu.memory_space<smem>>
    %72 = arith.index_cast %67 : i32 to index
    %c0_35 = arith.constant 0 : index
    %73 = vector.load %arg5[%72, %c0_35] : memref<128x32xf32, #tpu.memory_space<vmem>>, vector<64x32xf32>
    %74 = vector.broadcast %71 : f32 to vector<64x32xf32>
    %75 = arith.mulf %74, %73 : vector<64x32xf32>
    %76 = arith.addf %66, %75 : vector<64x32xf32>
    %c2_36 = arith.constant 2 : index
    %77 = memref.load %arg1[%c2_36] : memref<4xi32, #tpu.memory_space<smem>>
    %c4_i32_37 = arith.constant 4 : i32
    %78 = arith.muli %55, %c4_i32_37 : i32
    %c2_i32_38 = arith.constant 2 : i32
    %79 = arith.addi %78, %c2_i32_38 : i32
    %80 = arith.index_cast %79 : i32 to index
    %81 = memref.load %arg2[%80] : memref<16xf32, #tpu.memory_space<smem>>
    %82 = arith.index_cast %77 : i32 to index
    %c0_39 = arith.constant 0 : index
    %83 = vector.load %arg5[%82, %c0_39] : memref<128x32xf32, #tpu.memory_space<vmem>>, vector<64x32xf32>
    %84 = vector.broadcast %81 : f32 to vector<64x32xf32>
    %85 = arith.mulf %84, %83 : vector<64x32xf32>
    %86 = arith.addf %76, %85 : vector<64x32xf32>
    %c3_40 = arith.constant 3 : index
    %87 = memref.load %arg1[%c3_40] : memref<4xi32, #tpu.memory_space<smem>>
    %c4_i32_41 = arith.constant 4 : i32
    %88 = arith.muli %55, %c4_i32_41 : i32
    %c3_i32_42 = arith.constant 3 : i32
    %89 = arith.addi %88, %c3_i32_42 : i32
    %90 = arith.index_cast %89 : i32 to index
    %91 = memref.load %arg2[%90] : memref<16xf32, #tpu.memory_space<smem>>
    %92 = arith.index_cast %87 : i32 to index
    %c0_43 = arith.constant 0 : index
    %93 = vector.load %arg5[%92, %c0_43] : memref<128x32xf32, #tpu.memory_space<vmem>>, vector<64x32xf32>
    %94 = vector.broadcast %91 : f32 to vector<64x32xf32>
    %95 = arith.mulf %94, %93 : vector<64x32xf32>
    %96 = arith.addf %86, %95 : vector<64x32xf32>
    %c1_44 = arith.constant 1 : index
    %c0_45 = arith.constant 0 : index
    %c0_46 = arith.constant 0 : index
    %97 = vector.load %arg4[%c1_44, %c0_45, %c0_46] : memref<2x64x32xf32, #tpu.memory_space<vmem>>, vector<1x64x32xf32>
    %98 = vector.shape_cast %97 : vector<1x64x32xf32> to vector<64x32xf32>
    %99 = vector.shape_cast %96 : vector<64x32xf32> to vector<1x64x32xf32>
    tpu.vector_store %arg4[%c1_44, %c0_45, %c0_46], %99 {strides = array<i32>} : memref<2x64x32xf32, #tpu.memory_space<vmem>>, vector<1x64x32xf32>,
    return
  }
  func.func @transform_0(%arg0: i32) -> i32 {
    %c0_i32 = arith.constant 0 : i32
    %c0_i32_0 = arith.constant 0 : i32
    return %c0_i32 : i32
  }
  func.func @transform_1(%arg0: i32) -> i32 {
    %c0_i32 = arith.constant 0 : i32
    %c0_i32_0 = arith.constant 0 : i32
    return %c0_i32 : i32
  }
  func.func @transform_2(%arg0: i32) -> (i32, i32, i32) {
    %c0_i32 = arith.constant 0 : i32
    %c0_i32_0 = arith.constant 0 : i32
    %c0_i32_1 = arith.constant 0 : i32
    return %arg0, %c0_i32, %c0_i32_0 : i32, i32, i32
  }
  func.func @transform_3(%arg0: i32) -> (i32, i32, i32) {
    %c0_i32 = arith.constant 0 : i32
    %c0_i32_0 = arith.constant 0 : i32
    %c0_i32_1 = arith.constant 0 : i32
    return %arg0, %c0_i32, %c0_i32_0 : i32, i32, i32
  }
}

</mosaic_0001>

<bundles_post_ra>
// kernel: _lambda_.3
= control target key start
LH: loop header
LB: loop body
LE: loop exit
PB: predicated region body
PF: predicated region fallthrough
CT: control target
= control target key end

     0   :  { %8 = vsyncpa [#allocation4], 0  ;;  %s1072_s0 = inlined_call_operand.vmem [shape: s32[4], index: 0, kind: input, shape index: {}]   ;;  %s1073_s1 = inlined_call_operand.vmem [shape: f32[16], index: 1, kind: input, shape index: {}]   ;;  %s1074_s2 = inlined_call_operand.vmem [shape: f32[4,64,32], index: 2, kind: input, shape index: {}]   ;;  %s1075_s3 = inlined_call_operand.vmem [shape: f32[4,64,32], index: 3, kind: output, shape index: {}]  }
   0x1   :  { %9 = vsyncpa [#allocation6], 0  ;;  %s739_s12 = smov 0  }
   0x2 LB: > { %s745_s13 = sadd.s32 4294967295, %s715_s12   ;;  %p597_p0 = scmp.ge.s32.totalorder %s715_s12, 1  ;;  %s715_s12 = sphi %s739_s12, %s15_s12  }
   0x3   : > { %p114_p1 = scmp.lt.s32.totalorder %s715_s12, 3  ;;  %s126_s16 = sshll.u32 %s1072_s0, 4  ;;  %s127_s16 = int_to_ptr.vmem [resolvable:$true] %s126_s16 }
   0x4   : > { %p657_p3 = scmp.eq.s32.totalorder %s745_s13, 0  ;;  %s136_s19 = sshll.u32 %s1073_s1, 4  ;;  %s137_s19 = int_to_ptr.vmem [resolvable:$true] %s136_s19 }
   0x5   : > { %p115_p2 = pnand %p597_p0, %p114_p1  ;;  %s717_s20 = smov [#allocation3]  }
   0x6   : > { %s718_s21 = smov [#allocation5]  }
   0x7   : > { %p650_p4 = pneg %p115_p2 }
   0x8   : > { %159 = sbr.rel (%p115_p2) target bundleno = 101 (0x65), region = 32 }
   0x9   : > { %p651_p5 = pnand %p657_p3, %p650_p4 }
   0xb   : > { %653 = dma.vmem_to_smem (!%p651_p5), %s127_s16, 16, %s717_s20, [#allocation4]  }
   0xc   : > { %656 = dma.vmem_to_smem (!%p651_p5), %s137_s19, 16, %s718_s21, [#allocation6]  }
   0xd   : > { %706 = dma.done.wait (%p657_p3), [#allocation4], 16  }
   0xe   : > { %708 = vsyncadd (%p657_p3), [#allocation4], 4294967280 }
   0xf   : > { %710 = dma.done.wait (%p657_p3), [#allocation6], 16  }
  0x10   : > { %712 = vsyncadd (%p657_p3), [#allocation6], 4294967280 }
  0x11   : > { %171 = sfence }
  0x12   : > { %s604_s22 = sshll.u32 %s745_s13, 1  ;;  %vm214_vm0 = vcmask 261120   ;;  %s231_s27 = sld [smem:[#allocation3]] }
  0x13   : > { %p193_p6 = scmp.lt.s32.totalorder %s604_s22, 3  ;;  %s611_s28 = sld [smem:[#allocation3 + $0x1]] }
  0x14   : > { %s802_s29 = sshll.u32 %s745_s13, 3  ;;  %s612_s30 = sld [smem:[#allocation3 + $0x2]] }
  0x15   : > { %s1077_s22 = smov (!%p193_p6, %s604_s22), 3  ;;  %s804_s4 = sld [smem:[#allocation3 + $0x3]] }
  0x16   : > { %s637_s23 = sshll.u32 %s1077_s22, 6  ;;  %s261_s5 = sadd.s32 1, %s802_s29 }
  0x17   : > { %s775_s26 = scalar_lea.vmem %s1074_s2, %s637_s23  ;;  %s808_s6 = sld [smem:[#allocation5 + %s802_s29]] }
  0x18   : > { %v206_v0 = vld [vmem:[%s775_s26] sm:$0xff]  ;;  %v207_v1 = vld [vmem:[%s775_s26 + $0x8] sm:$0xff]  ;;  %v208_v2 = vld [vmem:[%s775_s26 + $0x10] sm:$0xff]  ;;  %s810_s7 = sld [smem:[#allocation5 + %s261_s5]]  ;;  %s290_s8 = sadd.s32 2, %s802_s29 }
  0x19   : > { %215 = vst.msk [vmem:[#allocation2] sm:$0xff] %vm214_vm0, %v206_v0  ;;  %v209_v3 = vld [vmem:[%s775_s26 + $0x18] sm:$0xff]  ;;  %v210_v4 = vld [vmem:[%s775_s26 + $0x20] sm:$0xff]  ;;  %v211_v5 = vld [vmem:[%s775_s26 + $0x28] sm:$0xff]  ;;  %s319_s9 = sadd.s32 3, %s802_s29  ;;  %s817_s10 = scalar_lea.vmem [#allocation2], %s231_s27 }
  0x1a   : > { %223 = vst.msk [vmem:[#allocation2 + $0x40] sm:$0xff] %vm214_vm0, %v206_v0  ;;  %v212_v6 = vld [vmem:[%s775_s26 + $0x30] sm:$0xff]  ;;  %v213_v7 = vld [vmem:[%s775_s26 + $0x38] sm:$0xff]  ;;  %v815_v8 = vld [vmem:[%s775_s26 + $0x40] sm:$0xff]  ;;  %s831_s11 = scalar_lea.vmem [#allocation2], %s611_s28  ;;  %s841_s13 = scalar_lea.vmem [#allocation2], %s612_s30 }
  0x1b   : > { %216 = vst.msk [vmem:[#allocation2 + $0x8] sm:$0xff] %vm214_vm0, %v207_v1  ;;  %s852_s14 = sld [smem:[#allocation5 + %s290_s8]]  ;;  %v615_v30 = vld [vmem:[%s775_s26 + $0x48] sm:$0xff]  ;;  %s866_s15 = scalar_lea.vmem [#allocation2], %s804_s4  ;;  %v616_v42 = vld [vmem:[%s775_s26 + $0x50] sm:$0xff]  ;;  %v617_v45 = vld [vmem:[%s775_s26 + $0x58] sm:$0xff] }
  0x1c   : > { %224 = vst.msk [vmem:[#allocation2 + $0x48] sm:$0xff] %vm214_vm0, %v207_v1  ;;  %s320_s16 = sld [smem:[#allocation5 + %s319_s9]]  ;;  %v618_v48 = vld [vmem:[%s775_s26 + $0x60] sm:$0xff]  ;;  %v619_v51 = vld [vmem:[%s775_s26 + $0x68] sm:$0xff]  ;;  %v620_v54 = vld [vmem:[%s775_s26 + $0x70] sm:$0xff]  ;;  %s910_s17 = sadd.s32 4, %s802_s29 }
  0x1d   : > { %217 = vst.msk [vmem:[#allocation2 + $0x10] sm:$0xff] %vm214_vm0, %v208_v2  ;;  %v243_v34 = vstv %s808_s6  ;;  %v621_v58 = vld [vmem:[%s775_s26 + $0x78] sm:$0xff]  ;;  %s412_s18 = sadd.s32 1, %s910_s17  ;;  %s441_s19 = sadd.s32 2, %s910_s17 }
  0x1e   : > { %225 = vst.msk [vmem:[#allocation2 + $0x50] sm:$0xff] %vm214_vm0, %v208_v2  ;;  %v272_v38 = vstv %s810_s7  ;;  %s926_s20 = sld [smem:[#allocation5 + %s910_s17]]  ;;  %s470_s21 = sadd.s32 3, %s910_s17 }
  0x1f   : > { %218 = vst.msk [vmem:[#allocation2 + $0x18] sm:$0xff] %vm214_vm0, %v209_v3  ;;  %s933_s24 = sld [smem:[#allocation5 + %s412_s18]]  ;;  %s947_s28 = scalar_lea.vmem %s1075_s3, %s637_s23 }
  0x20   : > { %226 = vst.msk [vmem:[#allocation2 + $0x58] sm:$0xff] %vm214_vm0, %v209_v3  ;;  %s939_s25 = sld [smem:[#allocation5 + %s441_s19]] }
  0x21   : > { %219 = vst.msk [vmem:[#allocation2 + $0x20] sm:$0xff] %vm214_vm0, %v210_v4  ;;  %v301_v55 = vstv %s852_s14  ;;  %s471_s29 = sld [smem:[#allocation5 + %s470_s21]] }
  0x22   : > { %227 = vst.msk [vmem:[#allocation2 + $0x60] sm:$0xff] %vm214_vm0, %v210_v4  ;;  %v907_v62 = vstv %s320_s16 }
  0x23   : > { %220 = vst.msk [vmem:[#allocation2 + $0x28] sm:$0xff] %vm214_vm0, %v211_v5 }
  0x24   : > { %228 = vst.msk [vmem:[#allocation2 + $0x68] sm:$0xff] %vm214_vm0, %v211_v5 }
  0x25   : > { %221 = vst.msk [vmem:[#allocation2 + $0x30] sm:$0xff] %vm214_vm0, %v212_v6 }
  0x26   : > { %229 = vst.msk [vmem:[#allocation2 + $0x70] sm:$0xff] %vm214_vm0, %v212_v6 }
  0x27   : > { %222 = vst.msk [vmem:[#allocation2 + $0x38] sm:$0xff] %vm214_vm0, %v213_v7 }
  0x28   : > { %230 = vst.msk [vmem:[#allocation2 + $0x78] sm:$0xff] %vm214_vm0, %v213_v7 }
  0x2f   : > { %v235_v9 = vld [vmem:[%s817_s10] sm:$0xff]  ;;  %v236_v10 = vld [vmem:[%s817_s10 + $0x8] sm:$0xff]  ;;  %v237_v11 = vld [vmem:[%s817_s10 + $0x10] sm:$0xff] }
  0x30   : > { %v238_v12 = vld [vmem:[%s817_s10 + $0x18] sm:$0xff]  ;;  %v239_v13 = vld [vmem:[%s817_s10 + $0x20] sm:$0xff]  ;;  %v240_v14 = vld [vmem:[%s817_s10 + $0x28] sm:$0xff]  ;;  %v244_v46 = vmul.f32 %v243_v34, %v235_v9  ;;  %v245_v49 = vmul.f32 %v243_v34, %v236_v10  ;;  %v246_v52 = vmul.f32 %v243_v34, %v237_v11 }
  0x31   : > { %v826_v15 = vld [vmem:[%s817_s10 + $0x30] sm:$0xff]  ;;  %v829_v16 = vld [vmem:[%s817_s10 + $0x38] sm:$0xff]  ;;  %v264_v17 = vld [vmem:[%s831_s11] sm:$0xff]  ;;  %v247_v56 = vmul.f32 %v243_v34, %v238_v12  ;;  %v248_v60 = vmul.f32 %v243_v34, %v239_v13  ;;  %v249_v0 = vmul.f32 %v243_v34, %v240_v14 }
  0x32   : > { %v265_v18 = vld [vmem:[%s831_s11 + $0x8] sm:$0xff]  ;;  %v266_v19 = vld [vmem:[%s831_s11 + $0x10] sm:$0xff]  ;;  %v267_v20 = vld [vmem:[%s831_s11 + $0x18] sm:$0xff]  ;;  %v273_v47 = vmul.f32 %v272_v38, %v264_v17  ;;  %v250_v4 = vmul.f32 %v243_v34, %v826_v15  ;;  %v251_v9 = vmul.f32 %v243_v34, %v829_v16 }
  0x33   : > { %v268_v21 = vld [vmem:[%s831_s11 + $0x20] sm:$0xff]  ;;  %v269_v22 = vld [vmem:[%s831_s11 + $0x28] sm:$0xff]  ;;  %v270_v23 = vld [vmem:[%s831_s11 + $0x30] sm:$0xff]  ;;  %v274_v50 = vmul.f32 %v272_v38, %v265_v18  ;;  %v275_v53 = vmul.f32 %v272_v38, %v266_v19  ;;  %v276_v57 = vmul.f32 %v272_v38, %v267_v20 }
  0x34   : > { %v271_v24 = vld [vmem:[%s831_s11 + $0x38] sm:$0xff]  ;;  %v293_v25 = vld [vmem:[%s841_s13] sm:$0xff]  ;;  %v294_v26 = vld [vmem:[%s841_s13 + $0x8] sm:$0xff]  ;;  %v281_v59 = vadd.f32 %v273_v47, %v244_v46  ;;  %v277_v61 = vmul.f32 %v272_v38, %v268_v21  ;;  %v278_v1 = vmul.f32 %v272_v38, %v269_v22  ;;  %v279_v5 = vmul.f32 %v272_v38, %v270_v23 }
  0x35   : > { %v295_v27 = vld [vmem:[%s841_s13 + $0x10] sm:$0xff]  ;;  %v847_v28 = vld [vmem:[%s841_s13 + $0x18] sm:$0xff]  ;;  %v850_v29 = vld [vmem:[%s841_s13 + $0x20] sm:$0xff]  ;;  %v282_v63 = vadd.f32 %v274_v50, %v245_v49  ;;  %v302_v2 = vmul.f32 %v301_v55, %v293_v25  ;;  %v283_v3 = vadd.f32 %v275_v53, %v246_v52  ;;  %v303_v6 = vmul.f32 %v301_v55, %v294_v26 }
  0x36   : > { %v856_v31 = vld [vmem:[%s841_s13 + $0x28] sm:$0xff]  ;;  %v859_v32 = vld [vmem:[%s841_s13 + $0x30] sm:$0xff]  ;;  %v862_v33 = vld [vmem:[%s841_s13 + $0x38] sm:$0xff]  ;;  %v284_v7 = vadd.f32 %v276_v57, %v247_v56  ;;  %v280_v10 = vmul.f32 %v272_v38, %v271_v24  ;;  %v304_v12 = vmul.f32 %v301_v55, %v295_v27  ;;  %v285_v13 = vadd.f32 %v277_v61, %v248_v60 }
  0x37   : > { %v322_v35 = vld [vmem:[%s866_s15] sm:$0xff]  ;;  %v870_v36 = vld [vmem:[%s866_s15 + $0x8] sm:$0xff]  ;;  %v873_v37 = vld [vmem:[%s866_s15 + $0x10] sm:$0xff]  ;;  %v310_v11 = vadd.f32 %v302_v2, %v281_v59  ;;  %v311_v14 = vadd.f32 %v303_v6, %v282_v63  ;;  %v305_v15 = vmul.f32 %v301_v55, %v847_v28  ;;  %v286_v17 = vadd.f32 %v278_v1, %v249_v0 }
  0x38   : > { %v879_v39 = vld [vmem:[%s866_s15 + $0x18] sm:$0xff]  ;;  %v882_v40 = vld [vmem:[%s866_s15 + $0x20] sm:$0xff]  ;;  %v885_v41 = vld [vmem:[%s866_s15 + $0x28] sm:$0xff]  ;;  %v331_v16 = vmul.f32 %v907_v62, %v322_v35  ;;  %v312_v18 = vadd.f32 %v304_v12, %v283_v3  ;;  %v306_v19 = vmul.f32 %v301_v55, %v850_v29  ;;  %v332_v20 = vmul.f32 %v907_v62, %v870_v36 }
  0x39   : > { %v889_v43 = vld [vmem:[%s866_s15 + $0x30] sm:$0xff]  ;;  %v892_v44 = vld [vmem:[%s866_s15 + $0x38] sm:$0xff]  ;;  %v313_v21 = vadd.f32 %v305_v15, %v284_v7  ;;  %v307_v22 = vmul.f32 %v301_v55, %v856_v31  ;;  %v288_v23 = vadd.f32 %v280_v10, %v251_v9  ;;  %v333_v25 = vmul.f32 %v907_v62, %v873_v37 }
  0x3a   : > { %364 = vst.msk [vmem:[#allocation2] sm:$0xff] %vm214_vm0, %v815_v8  ;;  %v339_v24 = vadd.f32 %v331_v16, %v310_v11  ;;  %v314_v26 = vadd.f32 %v306_v19, %v285_v13  ;;  %v308_v27 = vmul.f32 %v301_v55, %v859_v32  ;;  %v340_v28 = vadd.f32 %v332_v20, %v311_v14 }
  0x3b   : > { %365 = vst.msk [vmem:[#allocation2 + $0x8] sm:$0xff] %vm214_vm0, %v615_v30  ;;  %v334_v29 = vmul.f32 %v907_v62, %v879_v39  ;;  %v309_v31 = vmul.f32 %v301_v55, %v862_v33  ;;  %v341_v32 = vadd.f32 %v333_v25, %v312_v18  ;;  %v335_v34 = vmul.f32 %v907_v62, %v882_v40 }
  0x3c   : > { %366 = vst.msk [vmem:[#allocation2 + $0x10] sm:$0xff] %vm214_vm0, %v616_v42  ;;  %v336_v33 = vmul.f32 %v907_v62, %v885_v41  ;;  %v337_v39 = vmul.f32 %v907_v62, %v889_v43  ;;  %v973_v43 = vstv %s926_s20  ;;  %v976_v46 = vstv %s933_s24 }
  0x3d   : > { %367 = vst.msk [vmem:[#allocation2 + $0x18] sm:$0xff] %vm214_vm0, %v617_v45  ;;  %v342_v36 = vadd.f32 %v334_v29, %v313_v21  ;;  %v317_v37 = vadd.f32 %v309_v31, %v288_v23  ;;  %v343_v38 = vadd.f32 %v335_v34, %v314_v26  ;;  %v983_v47 = vstv %s471_s29 }
  0x3e   : > { %368 = vst.msk [vmem:[#allocation2 + $0x20] sm:$0xff] %vm214_vm0, %v618_v48 }
  0x3f   : > { %369 = vst.msk [vmem:[#allocation2 + $0x28] sm:$0xff] %vm214_vm0, %v619_v51 }
  0x40   : > { %370 = vst.msk [vmem:[#allocation2 + $0x30] sm:$0xff] %vm214_vm0, %v620_v54 }
  0x41   : > { %371 = vst.msk [vmem:[#allocation2 + $0x38] sm:$0xff] %vm214_vm0, %v621_v58 }
  0x42   : > { %372 = vst.msk [vmem:[#allocation2 + $0x40] sm:$0xff] %vm214_vm0, %v815_v8  ;;  %v287_v8 = vadd.f32 %v279_v5, %v250_v4 }
  0x43   : > { %373 = vst.msk [vmem:[#allocation2 + $0x48] sm:$0xff] %vm214_vm0, %v615_v30  ;;  %v315_v30 = vadd.f32 %v307_v22, %v286_v17 }
  0x44   : > { %374 = vst.msk [vmem:[#allocation2 + $0x50] sm:$0xff] %vm214_vm0, %v616_v42  ;;  %v316_v35 = vadd.f32 %v308_v27, %v287_v8  ;;  %v338_v42 = vmul.f32 %v907_v62, %v892_v44  ;;  %v981_v44 = vstv %s939_s25 }
  0x45   : > { %375 = vst.msk [vmem:[#allocation2 + $0x58] sm:$0xff] %vm214_vm0, %v617_v45  ;;  %v344_v40 = vadd.f32 %v336_v33, %v315_v30 }
  0x46   : > { %376 = vst.msk [vmem:[#allocation2 + $0x60] sm:$0xff] %vm214_vm0, %v618_v48  ;;  %v345_v41 = vadd.f32 %v337_v39, %v316_v35  ;;  %v346_v45 = vadd.f32 %v338_v42, %v317_v37 }
  0x47   : > { %377 = vst.msk [vmem:[#allocation2 + $0x68] sm:$0xff] %vm214_vm0, %v619_v51 }
  0x48   : > { %378 = vst.msk [vmem:[#allocation2 + $0x70] sm:$0xff] %vm214_vm0, %v620_v54 }
  0x49   : > { %379 = vst.msk [vmem:[#allocation2 + $0x78] sm:$0xff] %vm214_vm0, %v621_v58 }
  0x4a   : > { %347 = vst.msk [vmem:[%s947_s28] sm:$0xff] %vm214_vm0, %v339_v24 }
  0x4b   : > { %348 = vst.msk [vmem:[%s947_s28 + $0x8] sm:$0xff] %vm214_vm0, %v340_v28 }
  0x4c   : > { %349 = vst.msk [vmem:[%s947_s28 + $0x10] sm:$0xff] %vm214_vm0, %v341_v32 }
  0x4d   : > { %350 = vst.msk [vmem:[%s947_s28 + $0x18] sm:$0xff] %vm214_vm0, %v342_v36 }
  0x4e   : > { %351 = vst.msk [vmem:[%s947_s28 + $0x20] sm:$0xff] %vm214_vm0, %v343_v38 }
  0x4f   : > { %352 = vst.msk [vmem:[%s947_s28 + $0x28] sm:$0xff] %vm214_vm0, %v344_v40 }
  0x50   : > { %353 = vst.msk [vmem:[%s947_s28 + $0x30] sm:$0xff] %vm214_vm0, %v345_v41  ;;  %v386_v48 = vld [vmem:[%s817_s10] sm:$0xff]  ;;  %v387_v54 = vld [vmem:[%s817_s10 + $0x8] sm:$0xff]  ;;  %v388_v60 = vld [vmem:[%s817_s10 + $0x10] sm:$0xff] }
  0x51   : > { %v415_v49 = vld [vmem:[%s831_s11] sm:$0xff]  ;;  %354 = vst.msk [vmem:[%s947_s28 + $0x38] sm:$0xff] %vm214_vm0, %v346_v45  ;;  %v395_v51 = vmul.f32 %v973_v43, %v386_v48  ;;  %v416_v55 = vld [vmem:[%s831_s11 + $0x8] sm:$0xff]  ;;  %v396_v56 = vmul.f32 %v973_v43, %v387_v54  ;;  %v397_v0 = vmul.f32 %v973_v43, %v388_v60  ;;  %v417_v1 = vld [vmem:[%s831_s11 + $0x10] sm:$0xff] }
  0x52   : > { %v444_v50 = vld [vmem:[%s841_s13] sm:$0xff]  ;;  %v424_v52 = vmul.f32 %v976_v46, %v415_v49  ;;  %v425_v57 = vmul.f32 %v976_v46, %v416_v55  ;;  %v445_v58 = vld [vmem:[%s841_s13 + $0x8] sm:$0xff]  ;;  %v446_v2 = vld [vmem:[%s841_s13 + $0x10] sm:$0xff]  ;;  %v426_v7 = vmul.f32 %v976_v46, %v417_v1 }
  0x53   : > { %v473_v53 = vld [vmem:[%s866_s15] sm:$0xff]  ;;  %v474_v59 = vld [vmem:[%s866_s15 + $0x8] sm:$0xff]  ;;  %v453_v62 = vmul.f32 %v981_v44, %v444_v50  ;;  %v475_v3 = vld [vmem:[%s866_s15 + $0x10] sm:$0xff]  ;;  %v454_v5 = vmul.f32 %v981_v44, %v445_v58  ;;  %v455_v13 = vmul.f32 %v981_v44, %v446_v2 }
  0x54   : > { %v432_v61 = vadd.f32 %v424_v52, %v395_v51  ;;  %v482_v63 = vmul.f32 %v983_v47, %v473_v53  ;;  %v433_v4 = vadd.f32 %v425_v57, %v396_v56  ;;  %v483_v6 = vmul.f32 %v983_v47, %v474_v59  ;;  %v389_v9 = vld [vmem:[%s817_s10 + $0x18] sm:$0xff]  ;;  %v390_v16 = vld [vmem:[%s817_s10 + $0x20] sm:$0xff]  ;;  %v391_v23 = vld [vmem:[%s817_s10 + $0x28] sm:$0xff] }
  0x55   : > { %v418_v10 = vld [vmem:[%s831_s11 + $0x18] sm:$0xff]  ;;  %v398_v14 = vmul.f32 %v973_v43, %v389_v9  ;;  %v419_v18 = vld [vmem:[%s831_s11 + $0x20] sm:$0xff]  ;;  %v434_v8 = vadd.f32 %v426_v7, %v397_v0  ;;  %v484_v20 = vmul.f32 %v983_v47, %v475_v3  ;;  %v399_v21 = vmul.f32 %v973_v43, %v390_v16  ;;  %v420_v29 = vld [vmem:[%s831_s11 + $0x28] sm:$0xff] }
  0x56   : > { %v447_v11 = vld [vmem:[%s841_s13 + $0x18] sm:$0xff]  ;;  %v461_v12 = vadd.f32 %v453_v62, %v432_v61  ;;  %v427_v15 = vmul.f32 %v976_v46, %v418_v10  ;;  %v462_v19 = vadd.f32 %v454_v5, %v433_v4  ;;  %v448_v22 = vld [vmem:[%s841_s13 + $0x20] sm:$0xff]  ;;  %v428_v27 = vmul.f32 %v976_v46, %v419_v18  ;;  %v449_v35 = vld [vmem:[%s841_s13 + $0x28] sm:$0xff] }
  0x57   : > { %v476_v17 = vld [vmem:[%s866_s15 + $0x18] sm:$0xff]  ;;  %v456_v26 = vmul.f32 %v981_v44, %v447_v11  ;;  %v477_v28 = vld [vmem:[%s866_s15 + $0x20] sm:$0xff]  ;;  %v463_v31 = vadd.f32 %v455_v13, %v434_v8  ;;  %v400_v34 = vmul.f32 %v973_v43, %v391_v23  ;;  %v392_v36 = vld [vmem:[%s817_s10 + $0x30] sm:$0xff]  ;;  %v457_v39 = vmul.f32 %v981_v44, %v448_v22 }
  0x58   : > { %v490_v24 = vadd.f32 %v482_v63, %v461_v12  ;;  %v435_v25 = vadd.f32 %v427_v15, %v398_v14  ;;  %v491_v30 = vadd.f32 %v483_v6, %v462_v19  ;;  %v485_v32 = vmul.f32 %v983_v47, %v476_v17  ;;  %v421_v33 = vld [vmem:[%s831_s11 + $0x30] sm:$0xff]  ;;  %v393_v41 = vld [vmem:[%s817_s10 + $0x38] sm:$0xff]  ;;  %v478_v50 = vld [vmem:[%s866_s15 + $0x28] sm:$0xff] }
  0x59   : > { %v436_v38 = vadd.f32 %v428_v27, %v399_v21  ;;  %v429_v40 = vmul.f32 %v976_v46, %v420_v29  ;;  %v450_v42 = vld [vmem:[%s841_s13 + $0x30] sm:$0xff]  ;;  %v422_v45 = vld [vmem:[%s831_s11 + $0x38] sm:$0xff]  ;;  %v492_v48 = vadd.f32 %v484_v20, %v463_v31  ;;  %v486_v49 = vmul.f32 %v983_v47, %v477_v28 }
  0x5a   : > { %627 = vst.msk [vmem:[%s947_s28 + $0x40] sm:$0xff] %vm214_vm0, %v490_v24  ;;  %v464_v37 = vadd.f32 %v456_v26, %v435_v25  ;;  %v401_v51 = vmul.f32 %v973_v43, %v392_v36  ;;  %v430_v52 = vmul.f32 %v976_v46, %v421_v33  ;;  %v458_v56 = vmul.f32 %v981_v44, %v449_v35  ;;  %v479_v57 = vld [vmem:[%s866_s15 + $0x30] sm:$0xff]  ;;  %v451_v58 = vld [vmem:[%s841_s13 + $0x38] sm:$0xff] }
  0x5b   : > { %628 = vst.msk [vmem:[%s947_s28 + $0x48] sm:$0xff] %vm214_vm0, %v491_v30  ;;  %v465_v54 = vadd.f32 %v457_v39, %v436_v38  ;;  %v437_v55 = vadd.f32 %v429_v40, %v400_v34  ;;  %v459_v60 = vmul.f32 %v981_v44, %v450_v42  ;;  %v402_v61 = vmul.f32 %v973_v43, %v393_v41  ;;  %v480_v2 = vld [vmem:[%s866_s15 + $0x38] sm:$0xff] }
  0x5c   : > { %v493_v53 = vadd.f32 %v485_v32, %v464_v37  ;;  %629 = vst.msk [vmem:[%s947_s28 + $0x50] sm:$0xff] %vm214_vm0, %v492_v48  ;;  %v438_v59 = vadd.f32 %v430_v52, %v401_v51  ;;  %v431_v62 = vmul.f32 %v976_v46, %v422_v45  ;;  %v487_v1 = vmul.f32 %v983_v47, %v478_v50 }
  0x5d   : > { %v494_v63 = vadd.f32 %v486_v49, %v465_v54  ;;  %v466_v0 = vadd.f32 %v458_v56, %v437_v55  ;;  %v488_v4 = vmul.f32 %v983_v47, %v479_v57  ;;  %v460_v6 = vmul.f32 %v981_v44, %v451_v58 }
  0x5e   : > { %630 = vst.msk [vmem:[%s947_s28 + $0x58] sm:$0xff] %vm214_vm0, %v493_v53  ;;  %v467_v3 = vadd.f32 %v459_v60, %v438_v59  ;;  %v439_v5 = vadd.f32 %v431_v62, %v402_v61  ;;  %v489_v9 = vmul.f32 %v983_v47, %v480_v2 }
  0x5f   : > { %631 = vst.msk [vmem:[%s947_s28 + $0x60] sm:$0xff] %vm214_vm0, %v494_v63  ;;  %v495_v43 = vadd.f32 %v487_v1, %v466_v0 }
  0x60   : > { %v496_v7 = vadd.f32 %v488_v4, %v467_v3  ;;  %v468_v46 = vadd.f32 %v460_v6, %v439_v5 }
  0x61   : > { %632 = vst.msk [vmem:[%s947_s28 + $0x68] sm:$0xff] %vm214_vm0, %v495_v43 }
  0x62   : > { %633 = vst.msk [vmem:[%s947_s28 + $0x70] sm:$0xff] %vm214_vm0, %v496_v7  ;;  %v497_v10 = vadd.f32 %v489_v9, %v468_v46 }
  0x64   : > { %634 = vst.msk [vmem:[%s947_s28 + $0x78] sm:$0xff] %vm214_vm0, %v497_v10 }
  0x65 PF: > { %s15_s12 = sadd.s32 1, %s715_s12  }
  0x66   : > { %p12_p7 = scmp.ge.s32.totalorder %s15_s12, 4  }
  0x68   :  { %14 = sbr.rel (!%p12_p7) target bundleno = 2 (0x2), region = 81 }
  0x6d   :  { %531 = vsyncpa [#allocation4], 1 }
  0x6e   :  { %533 = vsyncpa [#allocation4 + $0x1], 1 }
  0x6f   :  { %534 = vsyncpa [#allocation6], 1 }

// kernel: _lambda_.2
= control target key start
LH: loop header
LB: loop body
LE: loop exit
PB: predicated region body
PF: predicated region fallthrough
CT: control target
= control target key end

     0   :  { %s1662_s9 = smov 0   ;;  %s2285_s0 = inlined_call_operand.vmem [shape: bf16[4,64,32], index: 0, kind: input, shape index: {}]   ;;  %s2286_s1 = inlined_call_operand.vmem [shape: bf16[4,64,32], index: 1, kind: input, shape index: {}]   ;;  %s2287_s2 = inlined_call_operand.vmem [shape: f32[4,1,64], index: 2, kind: output, shape index: {}]  }
   0x1 LB: > { %s1478_s10 = sadd.s32 4294967295, %s1633_s9   ;;  %p1482_p0 = scmp.ge.s32.totalorder %s1633_s9, 1  ;;  %s1633_s9 = sphi %s1662_s9, %s12_s9  }
   0x2   : > { %p126_p1 = scmp.lt.s32.totalorder %s1633_s9, 3 }
   0x4   : > { %p127_p2 = pnand %p1482_p0, %p126_p1 }
   0x5   : > { %s1483_s11 = sshll.u32 (!%p127_p2), %s1478_s10, 1  ;;  %s1635_s19 = smov (!%p127_p2), 63  }
   0x6   : > { %130 = sbr.rel (%p127_p2) target bundleno = 1010 (0x3f2), region = 28  ;;  %p155_p3 = scmp.lt.s32.totalorder (!%p127_p2), %s1483_s11, 3 }
   0x7   : > { %s1636_s20 = smov (!%p127_p2), 127   ;;  %s1637_s21 = smov (!%p127_p2), 62  }
   0x8   : > { %s1638_s22 = smov (!%p127_p2), 126   ;;  %s1639_s23 = smov (!%p127_p2), 124  }
   0x9   : > { %s1640_s24 = smov (!%p127_p2), 60   ;;  %s1641_s25 = smov (!%p127_p2), 96  }
   0xa   : > { %s1642_s26 = smov (!%p127_p2), 32   ;;  %s1643_s27 = smov (!%p127_p2), 56  }
   0xb   : > { %s2301_s11 = smov (!%p155_p3, %s1483_s11), 3  ;;  %vm239_vm0 = vcmask 261120   ;;  %v174_v40 = vlaneseq  ;;  %vm365_vm1 = vcmask 515072   ;;  %vm454_vm10 = vcmask 506880   ;;  %s1644_s28 = smov 120  }
   0xc   : > { %s1581_s12 = sshll.u32 %s2301_s11, 5  ;;  %s1645_s29 = smov 112  }
   0xd   : > { %s166_s15 = scalar_lea.vmem %s2286_s1, %s1581_s12  ;;  %s159_s18 = scalar_lea.vmem %s2285_s0, %s1581_s12  ;;  %v1791_v41 = vshrl.u32 %v174_v40, 7 }
   0xe   : > { %v1590_v0 = vld [vmem:[%s166_s15 + $0x18] sm:$0xff]  ;;  %v1589_v4 = vld [vmem:[%s166_s15 + $0x10] sm:$0xff]  ;;  %v1588_v8 = vld [vmem:[%s166_s15 + $0x8] sm:$0xff]  ;;  %s1646_s30 = smov 48   ;;  %s171_s5 = scalar_lea.vmem %s2287_s2, %s2301_s11 }
   0xf   : > { %v1598_v1 = vld [vmem:[%s166_s15 + $0x38] sm:$0xff]  ;;  %v262_v2 = vsel %vm239_vm0, %v1590_v0, 0  ;;  %v1597_v5 = vld [vmem:[%s166_s15 + $0x30] sm:$0xff]  ;;  %v259_v6 = vsel %vm239_vm0, %v1589_v4, 0  ;;  %v1596_v9 = vld [vmem:[%s166_s15 + $0x28] sm:$0xff]  ;;  %v256_v10 = vsel %vm239_vm0, %v1588_v8, 0 }
  0x10   : > { %v930_v3 = vsel %vm239_vm0, %v1598_v1, 0  ;;  %268 = vmatpush.bf16.xpose.msra.mxu0 %v262_v2  ;;  %1599 = vmatpush.bf16.xpose.msra.mxu2 %v262_v2  ;;  %v927_v7 = vsel %vm239_vm0, %v1597_v5, 0  ;;  %v924_v11 = vsel %vm239_vm0, %v1596_v9, 0  ;;  %v1587_v12 = vld [vmem:[%s166_s15] sm:$0xff]  ;;  %v1593_v18 = vld [vmem:[%s159_s18 + $0x30] sm:$0xff]  ;;  %v1584_v20 = vld [vmem:[%s159_s18 + $0x8] sm:$0xff] }
  0x11   : > { %936 = vmatpush.bf16.xpose.msra.mxu1 %v930_v3  ;;  %1603 = vmatpush.bf16.xpose.msra.mxu3 %v930_v3  ;;  %v1595_v13 = vld [vmem:[%s166_s15 + $0x20] sm:$0xff]  ;;  %v253_v14 = vsel %vm239_vm0, %v1587_v12, 0  ;;  %v1585_v19 = vld [vmem:[%s159_s18 + $0x10] sm:$0xff]  ;;  %v1592_v21 = vld [vmem:[%s159_s18 + $0x28] sm:$0xff]  ;;  %v293_v43 = vand.u32 1, %v1791_v41  ;;  %v1802_v49 = vadd.s32 32, %v1791_v41 }
  0x12   : > { %v921_v15 = vsel %vm239_vm0, %v1595_v13, 0  ;;  %v1583_v16 = vld [vmem:[%s159_s18] sm:$0xff]  ;;  %v1594_v22 = vld [vmem:[%s159_s18 + $0x38] sm:$0xff]  ;;  %v1814_v55 = vadd.s32 40, %v1791_v41  ;;  %v1846_v5 = vadd.s32 8, %v1791_v41 }
  0x13   : > { %v1591_v17 = vld [vmem:[%s159_s18 + $0x20] sm:$0xff]  ;;  %v1586_v23 = vld [vmem:[%s159_s18 + $0x18] sm:$0xff]  ;;  %vm301_vm2 = vcmp.ne.s32.totalorder %v293_v43, 0  ;;  %v297_v53 = vand.u32 1, %v1802_v49 }
  0x14   : > { %v298_v60 = vand.u32 1, %v1814_v55  ;;  %v294_v8 = vand.u32 1, %v1846_v5 }
  0x15   : > { %vm305_vm3 = vcmp.ne.s32.totalorder %v297_v53, 0 }
  0x16   : > { %vm1825_vm4 = vcmp.ne.s32.totalorder %v298_v60, 0  ;;  %vm302_vm5 = vcmp.ne.s32.totalorder %v294_v8, 0 }
  0x18   : > { %269 = vmatpush.bf16.xpose.msra.mxu0 %v259_v6  ;;  %1600 = vmatpush.bf16.xpose.msra.mxu2 %v259_v6 }
  0x19   : > { %937 = vmatpush.bf16.xpose.msra.mxu1 %v927_v7  ;;  %1604 = vmatpush.bf16.xpose.msra.mxu3 %v927_v7 }
  0x20   : > { %270 = vmatpush.bf16.xpose.msra.mxu0 %v256_v10  ;;  %1601 = vmatpush.bf16.xpose.msra.mxu2 %v256_v10 }
  0x21   : > { %938 = vmatpush.bf16.xpose.msra.mxu1 %v924_v11  ;;  %1605 = vmatpush.bf16.xpose.msra.mxu3 %v924_v11 }
  0x28   : > { %271 = vmatpush.bf16.xpose.msra.mxu0 %v253_v14  ;;  %1602 = vmatpush.bf16.xpose.msra.mxu2 %v253_v14 }
  0x29   : > { %939 = vmatpush.bf16.xpose.msra.mxu1 %v921_v15  ;;  %1606 = vmatpush.bf16.xpose.msra.mxu3 %v921_v15 }
  0x2f   : > { %1522 = vmatmul.msk.bf16.vlgmr.msra.gmra.mxu0 %vm239_vm0, %v1583_v16  ;;  %1524 = vmatmul.msk.bf16.vlgmr.msra.gmra.mxu2 %vm239_vm0, %v1585_v19 }
  0x30   : > { %1574 = vmatmul.msk.bf16.vlgmr.msra.gmra.mxu1 %vm239_vm0, %v1591_v17  ;;  %1576 = vmatmul.msk.bf16.vlgmr.msra.gmra.mxu3 %vm239_vm0, %v1593_v18  ;;  %v1866_v18 = vadd.s32 16, %v1791_v41 }
  0x3f   : > { %1523 = vmatmul.msk.bf16.gmra.mxu0 %vm239_vm0, %v1584_v20  ;;  %1525 = vmatmul.msk.bf16.gmra.mxu2 %vm239_vm0, %v1586_v23  ;;  %v295_v23 = vand.u32 1, %v1866_v18 }
  0x40   : > { %1575 = vmatmul.msk.bf16.gmra.mxu1 %vm239_vm0, %v1592_v21  ;;  %1577 = vmatmul.msk.bf16.gmra.mxu3 %vm239_vm0, %v1594_v22 }
  0x41   : > { %vm303_vm6 = vcmp.ne.s32.totalorder %v295_v23, 0 }
  0xac   : > { %v273_v24 = vpop.f32.mrf.mxu0 }
  0xad   : > { %341 = vrot.lane.b32.xlu2 %v273_v24, %s1635_s19  ;;  %317 = vrot.lane.b32.xlu0 %v273_v24, %s1636_s20  ;;  %v1701_v25 = vpop.f32.mrf.mxu1 }
  0xb2   : > { %v1711_v27 = vpop.f32.mrf.mxu2 }
  0xb3   : > { %v1703_v26 = vpop.f32.mrf.mxu3 }
  0xb4   : > { %1001 = vrot.lane.b32.xlu1 %v1703_v26, %s1635_s19  ;;  %v1721_v29 = vpop.f32.mrf.mxu0 }
  0xb5   : > { %969 = vrot.lane.b32.xlu2 %v1701_v25, %s1636_s20  ;;  %993 = vrot.lane.b32.xlu0 %v1701_v25, %s1635_s19  ;;  %v1713_v28 = vpop.f32.mrf.mxu1 }
  0xba   : > { %v1723_v30 = vpop.f32.mrf.mxu2 }
  0xbb   : > { %v1733_v32 = vpop.f32.mrf.mxu3 }
  0xbc   : > { %995 = vrot.lane.b32.xlu1 %v1713_v28, %s1635_s19  ;;  %v1731_v31 = vpop.f32.mrf.mxu0 }
  0xbd   : > { %325 = vrot.lane.b32.xlu2 %v1711_v27, %s1636_s20  ;;  %349 = vrot.lane.b32.xlu0 %v1711_v27, %s1635_s19  ;;  %v1741_v33 = vpop.f32.mrf.mxu1 }
  0xc2   : > { %v1751_v35 = vpop.f32.mrf.mxu2 }
  0xc3   : > { %v1749_v34 = vpop.f32.mrf.mxu3 }
  0xc4   : > { %351 = vrot.lane.b32.xlu1 %v1723_v30, %s1635_s19  ;;  %v1759_v36 = vpop.f32.mrf.mxu0 }
  0xc5   : > { %327 = vrot.lane.b32.xlu2 %v1723_v30, %s1636_s20  ;;  %977 = vrot.lane.b32.xlu0 %v1703_v26, %s1636_s20  ;;  %v1767_v37 = vpop.f32.mrf.mxu1 }
  0xca   : > { %v1775_v38 = vpop.f32.mrf.mxu2 }
  0xcb   : > { %v1779_v39 = vpop.f32.mrf.mxu3 }
  0xcc   : > { %321 = vrot.lane.b32.xlu1 %v1731_v31, %s1636_s20 }
  0xcd   : > { %979 = vrot.lane.b32.xlu2 %v1733_v32, %s1636_s20  ;;  %319 = vrot.lane.b32.xlu0 %v1721_v29, %s1636_s20 }
  0xd4   : > { %345 = vrot.lane.b32.xlu1 %v1731_v31, %s1635_s19 }
  0xd5   : > { %973 = vrot.lane.b32.xlu2 %v1741_v33, %s1636_s20  ;;  %343 = vrot.lane.b32.xlu0 %v1721_v29, %s1635_s19 }
  0xdc   : > { %981 = vrot.lane.b32.xlu1 %v1749_v34, %s1636_s20 }
  0xdd   : > { %353 = vrot.lane.b32.xlu2 %v1751_v35, %s1635_s19  ;;  %971 = vrot.lane.b32.xlu0 %v1713_v28, %s1636_s20 }
  0xe4   : > { %323 = vrot.lane.b32.xlu1 %v1759_v36, %s1636_s20 }
  0xe5   : > { %1005 = vrot.lane.b32.xlu2 %v1749_v34, %s1635_s19  ;;  %1003 = vrot.lane.b32.xlu0 %v1733_v32, %s1635_s19 }
  0xec   : > { %999 = vrot.lane.b32.xlu1 %v1767_v37, %s1635_s19 }
  0xed   : > { %997 = vrot.lane.b32.xlu0 %v1741_v33, %s1635_s19  ;;  %347 = vrot.lane.b32.xlu2 %v1759_v36, %s1635_s19 }
  0xf4   : > { %331 = vrot.lane.b32.xlu1 %v1775_v38, %s1636_s20 }
  0xf5   : > { %329 = vrot.lane.b32.xlu0 %v1751_v35, %s1636_s20  ;;  %1007 = vrot.lane.b32.xlu2 %v1779_v39, %s1635_s19 }
  0xfc   : > { %983 = vrot.lane.b32.xlu1 %v1779_v39, %s1636_s20 }
  0xfd   : > { %975 = vrot.lane.b32.xlu0 %v1767_v37, %s1636_s20 }
 0x105   : > { %355 = vrot.lane.b32.xlu0 %v1775_v38, %s1635_s19 }
 0x107   : > { %v342_v42 = vpop.permute.xlu2 %341 }
 0x10f   : > { %v970_v47 = vpop.permute.xlu2 %969 }
 0x117   : > { %v326_v54 = vpop.permute.xlu2 %325 }
 0x11f   : > { %v318_v44 = vpop.permute.xlu0 %317  ;;  %v328_v62 = vpop.permute.xlu2 %327 }
 0x120   : > { %v366_v45 = vsel %vm365_vm1, %v318_v44, %v342_v42 }
 0x121   : > { %v1795_v46 = vsel %vm301_vm2, %v366_v45, %v273_v24 }
 0x122   : > { %430 = vrot.lane.b32.xlu0 %v1795_v46, %s1637_s21  ;;  %406 = vrot.lane.b32.xlu1 %v1795_v46, %s1638_s22 }
 0x126   : > { %v1002_v48 = vpop.permute.xlu1 %1001 }
 0x127   : > { %v994_v50 = vpop.permute.xlu0 %993  ;;  %v980_v13 = vpop.permute.xlu2 %979 }
 0x128   : > { %v1017_v51 = vsel %vm365_vm1, %v970_v47, %v994_v50  ;;  %v1909_v47 = vadd.s32 24, %v1791_v41 }
 0x129   : > { %v1806_v52 = vsel %vm301_vm2, %v1017_v51, %v1701_v25 }
 0x12a   : > { %1041 = vrot.lane.b32.xlu0 %v1806_v52, %s1638_s22  ;;  %1065 = vrot.lane.b32.xlu1 %v1806_v52, %s1637_s21  ;;  %v296_v51 = vand.u32 1, %v1909_v47 }
 0x12c   : > { %vm304_vm8 = vcmp.ne.s32.totalorder %v296_v51, 0 }
 0x12e   : > { %v996_v56 = vpop.permute.xlu1 %995 }
 0x12f   : > { %v350_v57 = vpop.permute.xlu0 %349  ;;  %v974_v19 = vpop.permute.xlu2 %973 }
 0x130   : > { %v370_v58 = vsel %vm365_vm1, %v326_v54, %v350_v57 }
 0x131   : > { %v1818_v59 = vsel %vm305_vm3, %v370_v58, %v1711_v27 }
 0x132   : > { %414 = vrot.lane.b32.xlu2 %v1818_v59, %s1638_s22  ;;  %438 = vrot.lane.b32.xlu1 %v1818_v59, %s1637_s21 }
 0x136   : > { %v352_v63 = vpop.permute.xlu1 %351 }
 0x137   : > { %v371_v0 = vsel %vm365_vm1, %v328_v62, %v352_v63  ;;  %v978_v1 = vpop.permute.xlu0 %977 }
 0x138   : > { %v1021_v2 = vsel %vm365_vm1, %v978_v1, %v1002_v48  ;;  %v1834_v3 = vsel %vm1825_vm4, %v371_v0, %v1723_v30 }
 0x139   : > { %416 = vrot.lane.b32.xlu0 %v1834_v3, %s1638_s22  ;;  %v1839_v4 = vsel %vm305_vm3, %v1021_v2, %v1703_v26  ;;  %v382_v2 = vand.u32 2, %v1791_v41 }
 0x13a   : > { %1073 = vrot.lane.b32.xlu2 %v1839_v4, %s1637_s21  ;;  %1049 = vrot.lane.b32.xlu1 %v1839_v4, %s1638_s22 }
 0x13b   : > { %vm390_vm11 = vcmp.ne.s32.totalorder %v382_v2, 0 }
 0x13e   : > { %v322_v6 = vpop.permute.xlu1 %321 }
 0x13f   : > { %v320_v7 = vpop.permute.xlu0 %319 }
 0x146   : > { %v346_v11 = vpop.permute.xlu1 %345 }
 0x147   : > { %v344_v9 = vpop.permute.xlu0 %343  ;;  %v368_v25 = vsel %vm365_vm1, %v322_v6, %v346_v11 }
 0x148   : > { %v367_v10 = vsel %vm365_vm1, %v320_v7, %v344_v9  ;;  %v1885_v30 = vsel %vm303_vm6, %v368_v25, %v1731_v31  ;;  %v387_v25 = vand.u32 2, %v1814_v55 }
 0x149   : > { %v1851_v12 = vsel %vm302_vm5, %v367_v10, %v1721_v29  ;;  %v354_v29 = vpop.permute.xlu2 %353 }
 0x14a   : > { %408 = vrot.lane.b32.xlu2 %v1851_v12, %s1638_s22  ;;  %432 = vrot.lane.b32.xlu1 %v1851_v12, %s1637_s21  ;;  %vm1986_vm13 = vcmp.ne.s32.totalorder %v387_v25, 0 }
 0x14e   : > { %v982_v17 = vpop.permute.xlu1 %981 }
 0x14f   : > { %v972_v14 = vpop.permute.xlu0 %971 }
 0x150   : > { %v1018_v15 = vsel %vm365_vm1, %v972_v14, %v996_v56 }
 0x151   : > { %v1859_v16 = vsel %vm302_vm5, %v1018_v15, %v1713_v28  ;;  %v1882_v28 = vadd.s32 48, %v1791_v41  ;;  %v386_v15 = vand.u32 2, %v1802_v49 }
 0x152   : > { %1067 = vrot.lane.b32.xlu2 %v1859_v16, %s1637_s21  ;;  %1043 = vrot.lane.b32.xlu1 %v1859_v16, %s1638_s22 }
 0x153   : > { %v299_v40 = vand.u32 1, %v1882_v28  ;;  %vm394_vm12 = vcmp.ne.s32.totalorder %v386_v15, 0 }
 0x155   : > { %vm307_vm7 = vcmp.ne.s32.totalorder %v299_v40, 0 }
 0x156   : > { %v324_v24 = vpop.permute.xlu1 %323 }
 0x157   : > { %v1004_v20 = vpop.permute.xlu0 %1003 }
 0x158   : > { %v1022_v21 = vsel %vm365_vm1, %v980_v13, %v1004_v20 }
 0x159   : > { %v1872_v22 = vsel %vm1825_vm4, %v1022_v21, %v1733_v32  ;;  %vm543_vm4 = vcmask 490496  }
 0x15a   : > { %1075 = vrot.lane.b32.xlu0 %v1872_v22, %s1637_s21  ;;  %440 = vrot.lane.b32.xlu2 %v1834_v3, %s1637_s21 }
 0x15e   : > { %v1000_v42 = vpop.permute.xlu1 %999 }
 0x15f   : > { %v998_v26 = vpop.permute.xlu0 %997 }
 0x160   : > { %v1019_v27 = vsel %vm365_vm1, %v974_v19, %v998_v26 }
 0x161   : > { %v1888_v32 = vsel %vm303_vm6, %v1019_v27, %v1741_v33  ;;  %v1006_v33 = vpop.permute.xlu2 %1005 }
 0x162   : > { %410 = vrot.lane.b32.xlu0 %v1885_v30, %s1638_s22  ;;  %1051 = vrot.lane.b32.xlu2 %v1872_v22, %s1638_s22  ;;  %v1023_v45 = vsel %vm365_vm1, %v982_v17, %v1006_v33 }
 0x163   : > { %1069 = vrot.lane.b32.xlu1 %v1888_v32, %s1637_s21 }
 0x166   : > { %v332_v48 = vpop.permute.xlu1 %331 }
 0x167   : > { %v330_v43 = vpop.permute.xlu0 %329 }
 0x168   : > { %v372_v44 = vsel %vm365_vm1, %v330_v43, %v354_v29 }
 0x169   : > { %v1899_v31 = vsel %vm307_vm7, %v372_v44, %v1751_v35  ;;  %v1912_v35 = vsel %vm307_vm7, %v1023_v45, %v1749_v34  ;;  %v348_v53 = vpop.permute.xlu2 %347  ;;  %v1924_v34 = vadd.s32 56, %v1791_v41 }
 0x16a   : > { %1045 = vrot.lane.b32.xlu0 %v1888_v32, %s1638_s22  ;;  %434 = vrot.lane.b32.xlu2 %v1885_v30, %s1637_s21  ;;  %v369_v54 = vsel %vm365_vm1, %v324_v24, %v348_v53 }
 0x16b   : > { %418 = vrot.lane.b32.xlu1 %v1899_v31, %s1638_s22  ;;  %v1927_v57 = vsel %vm304_vm8, %v369_v54, %v1759_v36  ;;  %v300_v60 = vand.u32 1, %v1924_v34 }
 0x16d   : > { %vm308_vm9 = vcmp.ne.s32.totalorder %v300_v60, 0 }
 0x16e   : > { %v984_v61 = vpop.permute.xlu1 %983 }
 0x16f   : > { %v976_v50 = vpop.permute.xlu0 %975 }
 0x170   : > { %v1020_v56 = vsel %vm365_vm1, %v976_v50, %v1000_v42 }
 0x171   : > { %v1930_v58 = vsel %vm304_vm8, %v1020_v56, %v1767_v37  ;;  %v1008_v63 = vpop.permute.xlu2 %1007 }
 0x172   : > { %442 = vrot.lane.b32.xlu0 %v1899_v31, %s1637_s21  ;;  %1077 = vrot.lane.b32.xlu2 %v1912_v35, %s1637_s21  ;;  %v1024_v36 = vsel %vm365_vm1, %v984_v61, %v1008_v63 }
 0x173   : > { %1053 = vrot.lane.b32.xlu1 %v1912_v35, %s1638_s22  ;;  %v1945_v1 = vsel %vm308_vm9, %v1024_v36, %v1779_v39 }
 0x177   : > { %v356_v62 = vpop.permute.xlu0 %355 }
 0x178   : > { %v373_v0 = vsel %vm365_vm1, %v332_v48, %v356_v62 }
 0x179   : > { %v1942_v37 = vsel %vm308_vm9, %v373_v0, %v1775_v38 }
 0x17a   : > { %436 = vrot.lane.b32.xlu0 %v1927_v57, %s1637_s21  ;;  %1071 = vrot.lane.b32.xlu2 %v1930_v58, %s1637_s21 }
 0x17b   : > { %412 = vrot.lane.b32.xlu1 %v1927_v57, %s1638_s22 }
 0x182   : > { %420 = vrot.lane.b32.xlu2 %v1942_v37, %s1638_s22  ;;  %1055 = vrot.lane.b32.xlu0 %v1945_v1, %s1638_s22 }
 0x183   : > { %1047 = vrot.lane.b32.xlu1 %v1930_v58, %s1638_s22 }
 0x18b   : > { %444 = vrot.lane.b32.xlu1 %v1942_v37, %s1637_s21 }
 0x18c   : > { %v415_v6 = vpop.permute.xlu2 %414 }
 0x193   : > { %1079 = vrot.lane.b32.xlu1 %v1945_v1, %s1637_s21 }
 0x194   : > { %v431_v38 = vpop.permute.xlu0 %430  ;;  %v407_v39 = vpop.permute.xlu1 %406 }
 0x195   : > { %v455_v7 = vsel %vm454_vm10, %v407_v39, %v431_v38  ;;  %v1074_v9 = vpop.permute.xlu2 %1073 }
 0x196   : > { %v1960_v8 = vsel %vm390_vm11, %v455_v7, %v1795_v46 }
 0x197   : > { %495 = vrot.lane.b32.xlu2 %v1960_v8, %s1639_s23 }
 0x19b   : > { %519 = vrot.lane.b32.xlu1 %v1960_v8, %s1640_s24 }
 0x19c   : > { %v1042_v10 = vpop.permute.xlu0 %1041  ;;  %v1066_v11 = vpop.permute.xlu1 %1065 }
 0x19d   : > { %v1089_v13 = vsel %vm454_vm10, %v1042_v10, %v1066_v11 }
 0x19e   : > { %v1968_v14 = vsel %vm390_vm11, %v1089_v13, %v1806_v52 }
 0x1a4   : > { %v409_v46 = vpop.permute.xlu2 %408  ;;  %v439_v17 = vpop.permute.xlu1 %438 }
 0x1a5   : > { %v459_v19 = vsel %vm454_vm10, %v415_v6, %v439_v17 }
 0x1a6   : > { %v1973_v20 = vsel %vm394_vm12, %v459_v19, %v1818_v59  ;;  %v389_v19 = vand.u32 2, %v1924_v34 }
 0x1a7   : > { %527 = vrot.lane.b32.xlu2 %v1973_v20, %s1640_s24  ;;  %503 = vrot.lane.b32.xlu0 %v1973_v20, %s1639_s23 }
 0x1a8   : > { %vm397_vm3 = vcmp.ne.s32.totalorder %v389_v19, 0 }
 0x1ab   : > { %v417_v26 = vpop.permute.xlu0 %416 }
 0x1ac   : > { %v1068_v21 = vpop.permute.xlu2 %1067  ;;  %v1050_v23 = vpop.permute.xlu1 %1049 }
 0x1ad   : > { %v1093_v52 = vsel %vm454_vm10, %v1050_v23, %v1074_v9  ;;  %v385_v9 = vand.u32 2, %v1909_v47 }
 0x1ae   : > { %v1981_v24 = vsel %vm394_vm12, %v1093_v52, %v1839_v4  ;;  %v383_v4 = vand.u32 2, %v1846_v5 }
 0x1af   : > { %1121 = vrot.lane.b32.xlu2 %v1981_v24, %s1639_s23  ;;  %vm393_vm2 = vcmp.ne.s32.totalorder %v385_v9, 0 }
 0x1b0   : > { %vm391_vm14 = vcmp.ne.s32.totalorder %v383_v4, 0  ;;  %v475_v4 = vand.u32 4, %v1802_v49  ;;  %v472_v49 = vand.u32 4, %v1846_v5 }
 0x1b2   : > { %vm2099_vm5 = vcmp.ne.s32.totalorder %v475_v4, 0  ;;  %vm480_vm6 = vcmp.ne.s32.totalorder %v472_v49, 0 }
 0x1b4   : > { %v441_v27 = vpop.permute.xlu2 %440 }
 0x1b5   : > { %v460_v29 = vsel %vm454_vm10, %v417_v26, %v441_v27 }
 0x1b6   : > { %v1994_v40 = vsel %vm1986_vm13, %v460_v29, %v1834_v3 }
 0x1b7   : > { %505 = vrot.lane.b32.xlu1 %v1994_v40, %s1639_s23 }
 0x1bc   : > { %v433_v42 = vpop.permute.xlu1 %432 }
 0x1bd   : > { %v456_v43 = vsel %vm454_vm10, %v409_v46, %v433_v42 }
 0x1be   : > { %v2001_v44 = vsel %vm391_vm14, %v456_v43, %v1851_v12  ;;  %v1052_v12 = vpop.permute.xlu2 %1051 }
 0x1bf   : > { %521 = vrot.lane.b32.xlu2 %v2001_v44, %s1640_s24  ;;  %497 = vrot.lane.b32.xlu0 %v2001_v44, %s1639_s23 }
 0x1c4   : > { %v1044_v3 = vpop.permute.xlu1 %1043 }
 0x1c5   : > { %v1090_v33 = vsel %vm454_vm10, %v1044_v3, %v1068_v21 }
 0x1c6   : > { %v2009_v45 = vsel %vm391_vm14, %v1090_v33, %v1859_v16  ;;  %v384_v16 = vand.u32 2, %v1866_v18  ;;  %v435_v53 = vpop.permute.xlu2 %434  ;;  %vm826_vm14 = vcmask 523264  }
 0x1c7   : > { %1139 = vrot.lane.b32.xlu0 %v2009_v45, %s1640_s24  ;;  %1115 = vrot.lane.b32.xlu2 %v2009_v45, %s1639_s23 }
 0x1c8   : > { %vm392_vm15 = vcmp.ne.s32.totalorder %v384_v16, 0 }
 0x1cc   : > { %v1076_v48 = vpop.permute.xlu0 %1075 }
 0x1cd   : > { %v1094_v50 = vsel %vm454_vm10, %v1052_v12, %v1076_v48 }
 0x1ce   : > { %v2019_v51 = vsel %vm1986_vm13, %v1094_v50, %v1872_v22  ;;  %v1078_v2 = vpop.permute.xlu2 %1077  ;;  %vm632_vm13 = vcmask 457728  }
 0x1cf   : > { %1147 = vrot.lane.b32.xlu1 %v2019_v51, %s1640_s24  ;;  %529 = vrot.lane.b32.xlu0 %v1994_v40, %s1640_s24 }
 0x1d4   : > { %v411_v54 = vpop.permute.xlu0 %410 }
 0x1d5   : > { %v457_v56 = vsel %vm454_vm10, %v411_v54, %v435_v53  ;;  %v1070_v60 = vpop.permute.xlu1 %1069 }
 0x1d6   : > { %v2028_v61 = vsel %vm392_vm15, %v457_v56, %v1885_v30  ;;  %v388_v30 = vand.u32 2, %v1882_v28 }
 0x1d7   : > { %499 = vrot.lane.b32.xlu1 %v2028_v61, %s1639_s23  ;;  %1123 = vrot.lane.b32.xlu0 %v2019_v51, %s1639_s23 }
 0x1d8   : > { %vm396_vm1 = vcmp.ne.s32.totalorder %v388_v30, 0 }
 0x1dc   : > { %v1046_v22 = vpop.permute.xlu0 %1045 }
 0x1dd   : > { %v1091_v62 = vsel %vm454_vm10, %v1046_v22, %v1070_v60  ;;  %v419_v63 = vpop.permute.xlu1 %418  ;;  %v476_v22 = vand.u32 4, %v1814_v55 }
 0x1de   : > { %v2036_v36 = vsel %vm392_vm15, %v1091_v62, %v1888_v32  ;;  %vm721_vm15 = vcmask 392192  }
 0x1df   : > { %523 = vrot.lane.b32.xlu0 %v2028_v61, %s1640_s24  ;;  %1141 = vrot.lane.b32.xlu2 %v2036_v36, %s1640_s24  ;;  %vm2121_vm7 = vcmp.ne.s32.totalorder %v476_v22, 0 }
 0x1e0   : > { %1117 = vrot.lane.b32.xlu1 %v2036_v36, %s1639_s23 }
 0x1e4   : > { %v443_v0 = vpop.permute.xlu0 %442 }
 0x1e5   : > { %v461_v6 = vsel %vm454_vm10, %v419_v63, %v443_v0  ;;  %v1054_v38 = vpop.permute.xlu1 %1053 }
 0x1e6   : > { %v1095_v32 = vsel %vm454_vm10, %v1054_v38, %v1078_v2  ;;  %v2048_v39 = vsel %vm396_vm1, %v461_v6, %v1899_v31  ;;  %v473_v38 = vand.u32 4, %v1866_v18 }
 0x1e7   : > { %507 = vrot.lane.b32.xlu2 %v2048_v39, %s1639_s23  ;;  %v2053_v7 = vsel %vm396_vm1, %v1095_v32, %v1912_v35  ;;  %v1072_v35 = vpop.permute.xlu2 %1071  ;;  %vm848_vm1 = vcmask 516096  }
 0x1e8   : > { %531 = vrot.lane.b32.xlu1 %v2048_v39, %s1640_s24  ;;  %1149 = vrot.lane.b32.xlu0 %v2053_v7, %s1640_s24  ;;  %vm481_vm8 = vcmp.ne.s32.totalorder %v473_v38, 0 }
 0x1ec   : > { %v437_v10 = vpop.permute.xlu0 %436 }
 0x1ed   : > { %v413_v11 = vpop.permute.xlu1 %412 }
 0x1ee   : > { %v458_v31 = vsel %vm454_vm10, %v413_v11, %v437_v10 }
 0x1ef   : > { %1125 = vrot.lane.b32.xlu2 %v2053_v7, %s1639_s23  ;;  %v2064_v13 = vsel %vm393_vm2, %v458_v31, %v1927_v57  ;;  %v421_v57 = vpop.permute.xlu2 %420 }
 0x1f0   : > { %525 = vrot.lane.b32.xlu1 %v2064_v13, %s1640_s24 }
 0x1f5   : > { %v1048_v15 = vpop.permute.xlu1 %1047 }
 0x1f6   : > { %v1092_v46 = vsel %vm454_vm10, %v1048_v15, %v1072_v35  ;;  %v477_v15 = vand.u32 4, %v1882_v28  ;;  %v474_v28 = vand.u32 4, %v1909_v47 }
 0x1f7   : > { %501 = vrot.lane.b32.xlu2 %v2064_v13, %s1639_s23  ;;  %v2072_v17 = vsel %vm393_vm2, %v1092_v46, %v1930_v58  ;;  %v1056_v58 = vpop.permute.xlu0 %1055 }
 0x1f8   : > { %1143 = vrot.lane.b32.xlu0 %v2072_v17, %s1640_s24  ;;  %vm2140_vm9 = vcmp.ne.s32.totalorder %v477_v15, 0 }
 0x1fd   : > { %v445_v21 = vpop.permute.xlu1 %444 }
 0x1fe   : > { %v462_v23 = vsel %vm454_vm10, %v421_v57, %v445_v21 }
 0x1ff   : > { %1119 = vrot.lane.b32.xlu2 %v2072_v17, %s1639_s23  ;;  %v2081_v52 = vsel %vm397_vm3, %v462_v23, %v1942_v37  ;;  %v496_v37 = vpop.permute.xlu2 %495 }
 0x200   : > { %509 = vrot.lane.b32.xlu0 %v2081_v52, %s1639_s23 }
 0x205   : > { %v1080_v25 = vpop.permute.xlu1 %1079 }
 0x206   : > { %v1096_v59 = vsel %vm454_vm10, %v1056_v58, %v1080_v25  ;;  %vm482_vm10 = vcmp.ne.s32.totalorder %v474_v28, 0 }
 0x207   : > { %533 = vrot.lane.b32.xlu2 %v2081_v52, %s1640_s24  ;;  %v2089_v26 = vsel %vm397_vm3, %v1096_v59, %v1945_v1  ;;  %v528_v1 = vpop.permute.xlu2 %527 }
 0x208   : > { %1151 = vrot.lane.b32.xlu1 %v2089_v26, %s1640_s24  ;;  %1127 = vrot.lane.b32.xlu0 %v2089_v26, %s1639_s23 }
 0x20d   : > { %v520_v27 = vpop.permute.xlu1 %519 }
 0x20e   : > { %v2096_v29 = vsel %vm543_vm4, %v496_v37, %v520_v27 }
 0x20f   : > { %v2109_v12 = vpop.permute.xlu2 %1121 }
 0x219   : > { %v504_v43 = vpop.permute.xlu0 %503  ;;  %v522_v48 = vpop.permute.xlu2 %521 }
 0x21a   : > { %v548_v3 = vsel %vm543_vm4, %v504_v43, %v528_v1 }
 0x21b   : > { %v556_v33 = vsel %vm2099_vm5, %v548_v3, %v1973_v20 }
 0x21c   : > { %770 = vrot.lane.b32.xlu0 %v556_v33, %s1641_s25 }
 0x221   : > { %v1116_v20 = vpop.permute.xlu2 %1115 }
 0x224   : > { %794 = vrot.lane.b32.xlu0 %v556_v33, %s1642_s26 }
 0x229   : > { %v506_v56 = vpop.permute.xlu1 %505 }
 0x231   : > { %v498_v50 = vpop.permute.xlu0 %497 }
 0x232   : > { %v545_v16 = vsel %vm543_vm4, %v498_v50, %v522_v48 }
 0x233   : > { %v553_v53 = vsel %vm480_vm6, %v545_v16, %v2001_v44  ;;  %v471_v16 = vand.u32 4, %v1791_v41 }
 0x234   : > { %610 = vrot.lane.b32.xlu1 %v553_v53, %s1643_s27  ;;  %586 = vrot.lane.b32.xlu0 %v553_v53, %s1644_s28 }
 0x235   : > { %vm2187_vm12 = vcmp.ne.s32.totalorder %v471_v16, 0 }
 0x239   : > { %v1140_v54 = vpop.permute.xlu0 %1139  ;;  %v1142_v62 = vpop.permute.xlu2 %1141 }
 0x23a   : > { %v1162_v60 = vsel %vm543_vm4, %v1116_v20, %v1140_v54 }
 0x23b   : > { %v2118_v5 = vsel %vm480_vm6, %v1162_v60, %v2009_v45 }
 0x241   : > { %v530_v44 = vpop.permute.xlu0 %529  ;;  %v1148_v0 = vpop.permute.xlu1 %1147 }
 0x242   : > { %v549_v30 = vsel %vm543_vm4, %v506_v56, %v530_v44  ;;  %v508_v6 = vpop.permute.xlu2 %507 }
 0x243   : > { %v557_v2 = vsel %vm2121_vm7, %v549_v30, %v1994_v40 }
 0x244   : > { %618 = vrot.lane.b32.xlu0 %v557_v2, %s1643_s27  ;;  %594 = vrot.lane.b32.xlu2 %v557_v2, %s1644_s28 }
 0x249   : > { %v1124_v45 = vpop.permute.xlu0 %1123  ;;  %v500_v55 = vpop.permute.xlu1 %499 }
 0x24a   : > { %v1126_v35 = vpop.permute.xlu2 %1125 }
 0x251   : > { %v524_v32 = vpop.permute.xlu0 %523 }
 0x252   : > { %v546_v9 = vsel %vm543_vm4, %v500_v55, %v524_v32  ;;  %v1118_v10 = vpop.permute.xlu1 %1117 }
 0x253   : > { %v1163_v11 = vsel %vm543_vm4, %v1118_v10, %v1142_v62  ;;  %v554_v31 = vsel %vm481_vm8, %v546_v9, %v2028_v61 }
 0x254   : > { %677 = vrot.lane.b32.xlu2 %v554_v31, %s1645_s29  ;;  %v2137_v40 = vsel %vm481_vm8, %v1163_v11, %v2036_v36  ;;  %v502_v36 = vpop.permute.xlu2 %501 }
 0x25a   : > { %v532_v46 = vpop.permute.xlu1 %531  ;;  %v1150_v57 = vpop.permute.xlu0 %1149 }
 0x25b   : > { %v550_v19 = vsel %vm543_vm4, %v508_v6, %v532_v46 }
 0x25c   : > { %701 = vrot.lane.b32.xlu2 %v554_v31, %s1646_s30  ;;  %v558_v61 = vsel %vm2140_vm9, %v550_v19, %v2048_v39  ;;  %v1120_v25 = vpop.permute.xlu2 %1119  ;;  %v1166_v39 = vsel %vm543_vm4, %v1124_v45, %v1148_v0 }
 0x25d   : > { %709 = vrot.lane.b32.xlu1 %v558_v61, %s1646_s30  ;;  %685 = vrot.lane.b32.xlu0 %v558_v61, %s1645_s29  ;;  %v1174_v27 = vsel %vm2121_vm7, %v1166_v39, %v2019_v51 }
 0x262   : > { %v526_v21 = vpop.permute.xlu1 %525 }
 0x263   : > { %v547_v23 = vsel %vm543_vm4, %v502_v36, %v526_v21 }
 0x264   : > { %v555_v58 = vsel %vm482_vm10, %v547_v23, %v2064_v13  ;;  %v478_v13 = vand.u32 4, %v1924_v34  ;;  %v534_v4 = vpop.permute.xlu2 %533  ;;  %v1167_v34 = vsel %vm543_vm4, %v1126_v35, %v1150_v57 }
 0x265   : > { %614 = vrot.lane.b32.xlu2 %v555_v58, %s1643_s27  ;;  %590 = vrot.lane.b32.xlu1 %v555_v58, %s1644_s28 }
 0x266   : > { %vm486_vm11 = vcmp.ne.s32.totalorder %v478_v13, 0 }
 0x26a   : > { %v1144_v59 = vpop.permute.xlu0 %1143 }
 0x26b   : > { %v1164_v37 = vsel %vm543_vm4, %v1120_v25, %v1144_v59 }
 0x26c   : > { %v1172_v47 = vsel %vm482_vm10, %v1164_v37, %v2072_v17 }
 0x26d   : > { %1191 = vrot.lane.b32.xlu0 %v1172_v47, %s1644_s28  ;;  %1219 = vrot.lane.b32.xlu2 %v1174_v27, %s1643_s27 }
 0x26e   : > { %1215 = vrot.lane.b32.xlu1 %v1172_v47, %s1643_s27 }
 0x272   : > { %v510_v1 = vpop.permute.xlu0 %509 }
 0x273   : > { %v551_v43 = vsel %vm543_vm4, %v510_v1, %v534_v4 }
 0x274   : > { %v559_v3 = vsel %vm486_vm11, %v551_v43, %v2081_v52  ;;  %v1175_v52 = vsel %vm2140_vm9, %v1167_v34, %v2053_v7  ;;  %v552_v7 = vsel %vm2187_vm12, %v2096_v29, %v1960_v8 }
 0x275   : > { %598 = vrot.lane.b32.xlu0 %v559_v3, %s1644_s28  ;;  %v827_v22 = vsel %vm826_vm14, %v552_v7, 0.0 }
 0x276   : > { %1195 = vrot.lane.b32.xlu1 %v1174_v27, %s1644_s28 }
 0x27a   : > { %v1128_v51 = vpop.permute.xlu0 %1127  ;;  %v1152_v17 = vpop.permute.xlu1 %1151 }
 0x27b   : > { %v1168_v33 = vsel %vm543_vm4, %v1128_v51, %v1152_v17 }
 0x27c   : > { %v1176_v49 = vsel %vm486_vm11, %v1168_v33, %v2089_v26 }
 0x27d   : > { %1145 = vrot.lane.b32.xlu0 %v1981_v24, %s1640_s24  ;;  %1223 = vrot.lane.b32.xlu2 %v1176_v49, %s1643_s27 }
 0x27e   : > { %622 = vrot.lane.b32.xlu1 %v559_v3, %s1643_s27 }
 0x285   : > { %1269 = vrot.lane.b32.xlu0 %v1175_v52, %s1645_s29 }
 0x286   : > { %1199 = vrot.lane.b32.xlu1 %v1176_v49, %s1644_s28 }
 0x28e   : > { %1293 = vrot.lane.b32.xlu1 %v1175_v52, %s1646_s30  ;;  %v771_v26 = vpop.permute.xlu0 %770 }
 0x296   : > { %v795_v48 = vpop.permute.xlu0 %794 }
 0x297   : > { %v2184_v50 = vsel %vm239_vm0, %v771_v26, %v795_v48 }
 0x298   : > { %v834_v43 = vsel %vm826_vm14, %v2184_v50, 0.0 }
 0x29e   : > { %v595_v20 = vpop.permute.xlu2 %594 }
 0x2a6   : > { %v587_v54 = vpop.permute.xlu0 %586  ;;  %v611_v56 = vpop.permute.xlu1 %610 }
 0x2a7   : > { %v634_v60 = vsel %vm632_vm13, %v587_v54, %v611_v56 }
 0x2a8   : > { %v828_v41 = vsel %vm826_vm14, %v634_v60, 0.0 }
 0x2a9   : > { %v829_v62 = vadd.f32 %v828_v41, %v827_v22 }
 0x2ae   : > { %v678_v63 = vpop.permute.xlu2 %677 }
 0x2b6   : > { %v619_v44 = vpop.permute.xlu0 %618  ;;  %v702_v30 = vpop.permute.xlu2 %701 }
 0x2b7   : > { %v724_v0 = vsel %vm721_vm15, %v678_v63, %v702_v30  ;;  %v638_v2 = vsel %vm632_vm13, %v595_v20, %v619_v44 }
 0x2b8   : > { %v830_v8 = vsel %vm826_vm14, %v724_v0, 0.0  ;;  %772 = vrot.lane.b32.xlu1 %v638_v2, %s1641_s25 }
 0x2b9   : > { %v831_v29 = vadd.f32 %v830_v8, %v829_v62 }
 0x2bf   : > { %v615_v38 = vpop.permute.xlu2 %614 }
 0x2c0   : > { %796 = vrot.lane.b32.xlu1 %v638_v2, %s1642_s26 }
 0x2c7   : > { %v1220_v35 = vpop.permute.xlu2 %1219 }
 0x2cf   : > { %v686_v45 = vpop.permute.xlu0 %685  ;;  %v710_v6 = vpop.permute.xlu1 %709 }
 0x2d0   : > { %v728_v55 = vsel %vm721_vm15, %v686_v45, %v710_v6 }
 0x2d1   : > { %774 = vrot.lane.b32.xlu2 %v728_v55, %s1641_s25 }
 0x2d7   : > { %v591_v32 = vpop.permute.xlu1 %590  ;;  %v1224_v19 = vpop.permute.xlu2 %1223 }
 0x2d8   : > { %v636_v9 = vsel %vm632_vm13, %v591_v32, %v615_v38 }
 0x2d9   : > { %798 = vrot.lane.b32.xlu2 %v728_v55, %s1642_s26  ;;  %679 = vrot.lane.b32.xlu0 %v636_v9, %s1645_s29 }
 0x2df   : > { %v1192_v11 = vpop.permute.xlu0 %1191 }
 0x2e0   : > { %v1216_v10 = vpop.permute.xlu1 %1215 }
 0x2e1   : > { %1137 = vrot.lane.b32.xlu2 %v1968_v14, %s1640_s24  ;;  %703 = vrot.lane.b32.xlu0 %v636_v9, %s1646_s30  ;;  %v1236_v36 = vsel %vm632_vm13, %v1192_v11, %v1216_v10 }
 0x2e7   : > { %v599_v15 = vpop.permute.xlu0 %598 }
 0x2e8   : > { %v1196_v31 = vpop.permute.xlu1 %1195 }
 0x2e9   : > { %v1238_v23 = vsel %vm632_vm13, %v1196_v31, %v1220_v35 }
 0x2ef   : > { %v1146_v57 = vpop.permute.xlu0 %1145 }
 0x2f0   : > { %v623_v18 = vpop.permute.xlu1 %622  ;;  %v1165_v21 = vsel %vm543_vm4, %v2109_v12, %v1146_v57 }
 0x2f1   : > { %v640_v46 = vsel %vm632_vm13, %v599_v15, %v623_v18 }
 0x2f2   : > { %711 = vrot.lane.b32.xlu2 %v640_v46, %s1646_s30  ;;  %687 = vrot.lane.b32.xlu1 %v640_v46, %s1645_s29 }
 0x2f8   : > { %v1200_v61 = vpop.permute.xlu1 %1199 }
 0x2f9   : > { %v1240_v28 = vsel %vm632_vm13, %v1200_v61, %v1224_v19 }
 0x2fa   : > { %1113 = vrot.lane.b32.xlu1 %v1968_v14, %s1639_s23  ;;  %1295 = vrot.lane.b32.xlu0 %v1240_v28, %s1646_s30 }
 0x2fb   : > { %1271 = vrot.lane.b32.xlu2 %v1240_v28, %s1645_s29 }
 0x300   : > { %v1294_v58 = vpop.permute.xlu1 %1293 }
 0x302   : > { %1211 = vrot.lane.b32.xlu1 %v2118_v5, %s1643_s27  ;;  %1187 = vrot.lane.b32.xlu0 %v2118_v5, %s1644_s28  ;;  %v1173_v5 = vsel %vm2099_vm5, %v1165_v21, %v1981_v24 }
 0x303   : > { %1261 = vrot.lane.b32.xlu2 %v2137_v40, %s1645_s29 }
 0x30a   : > { %1263 = vrot.lane.b32.xlu1 %v1236_v36, %s1645_s29  ;;  %1285 = vrot.lane.b32.xlu0 %v2137_v40, %s1646_s30  ;;  %v1270_v40 = vpop.permute.xlu0 %1269 }
 0x30b   : > { %1287 = vrot.lane.b32.xlu2 %v1236_v36, %s1646_s30  ;;  %v1311_v25 = vsel %vm721_vm15, %v1270_v40, %v1294_v58 }
 0x312   : > { %1361 = vrot.lane.b32.xlu1 %v1173_v5, %s1642_s26  ;;  %1337 = vrot.lane.b32.xlu0 %v1173_v5, %s1641_s25 }
 0x313   : > { %1339 = vrot.lane.b32.xlu2 %v1238_v23, %s1641_s25 }
 0x31a   : > { %1363 = vrot.lane.b32.xlu0 %v1238_v23, %s1642_s26  ;;  %1341 = vrot.lane.b32.xlu1 %v1311_v25, %s1641_s25 }
 0x31b   : > { %1365 = vrot.lane.b32.xlu2 %v1311_v25, %s1642_s26 }
 0x32a   : > { %v773_v42 = vpop.permute.xlu1 %772 }
 0x32b   : > { %v775_v24 = vpop.permute.xlu2 %774 }
 0x332   : > { %v797_v12 = vpop.permute.xlu1 %796 }
 0x333   : > { %v799_v39 = vpop.permute.xlu2 %798  ;;  %v815_v59 = vsel %vm239_vm0, %v773_v42, %v797_v12 }
 0x334   : > { %v816_v37 = vsel %vm239_vm0, %v775_v24, %v799_v39  ;;  %v836_v51 = vsel %vm826_vm14, %v815_v59, 0.0 }
 0x335   : > { %v838_v49 = vsel %vm826_vm14, %v816_v37, 0.0 }
 0x33b   : > { %v1138_v17 = vpop.permute.xlu2 %1137 }
 0x34b   : > { %v680_v47 = vpop.permute.xlu0 %679 }
 0x34c   : > { %v712_v52 = vpop.permute.xlu2 %711 }
 0x353   : > { %v704_v27 = vpop.permute.xlu0 %703 }
 0x354   : > { %v725_v13 = vsel %vm721_vm15, %v680_v47, %v704_v27 }
 0x355   : > { %v832_v4 = vsel %vm826_vm14, %v725_v13, 0.0  ;;  %v1272_v16 = vpop.permute.xlu2 %1271 }
 0x356   : > { %v833_v1 = vadd.f32 %v832_v4, %v831_v29 }
 0x358   : > { %v835_v3 = vadd.f32 %v834_v43, %v833_v1 }
 0x35a   : > { %v837_v33 = vadd.f32 %v836_v51, %v835_v3 }
 0x35c   : > { %v839_v34 = vadd.f32 %v838_v49, %v837_v33 }
 0x35d   : > { %v1262_v20 = vpop.permute.xlu2 %1261 }
 0x364   : > { %v688_v26 = vpop.permute.xlu1 %687 }
 0x365   : > { %v729_v48 = vsel %vm721_vm15, %v688_v26, %v712_v52  ;;  %v1288_v60 = vpop.permute.xlu2 %1287 }
 0x366   : > { %800 = vrot.lane.b32.xlu0 %v729_v48, %s1642_s26  ;;  %776 = vrot.lane.b32.xlu2 %v729_v48, %s1641_s25 }
 0x36c   : > { %v1296_v7 = vpop.permute.xlu0 %1295  ;;  %v1114_v54 = vpop.permute.xlu1 %1113 }
 0x36d   : > { %v1312_v50 = vsel %vm721_vm15, %v1272_v16, %v1296_v7  ;;  %v1340_v62 = vpop.permute.xlu2 %1339  ;;  %v1161_v30 = vsel %vm543_vm4, %v1114_v54, %v1138_v17 }
 0x36e   : > { %1343 = vrot.lane.b32.xlu1 %v1312_v50, %s1641_s25  ;;  %1367 = vrot.lane.b32.xlu2 %v1312_v50, %s1642_s26  ;;  %v1169_v29 = vsel %vm2187_vm12, %v1161_v30, %v1968_v14 }
 0x36f   : > { %v1393_v38 = vsel %vm826_vm14, %v1169_v29, 0.0 }
 0x374   : > { %v1188_v56 = vpop.permute.xlu0 %1187  ;;  %v1212_v22 = vpop.permute.xlu1 %1211 }
 0x375   : > { %v1234_v0 = vsel %vm632_vm13, %v1188_v56, %v1212_v22  ;;  %v1366_v2 = vpop.permute.xlu2 %1365 }
 0x376   : > { %v1394_v6 = vsel %vm826_vm14, %v1234_v0, 0.0 }
 0x377   : > { %v1395_v9 = vadd.f32 %v1394_v6, %v1393_v38 }
 0x37c   : > { %v1286_v41 = vpop.permute.xlu0 %1285  ;;  %v1264_v63 = vpop.permute.xlu1 %1263 }
 0x37d   : > { %v1307_v45 = vsel %vm721_vm15, %v1262_v20, %v1286_v41  ;;  %v1308_v11 = vsel %vm721_vm15, %v1264_v63, %v1288_v60 }
 0x37e   : > { %v1396_v32 = vsel %vm826_vm14, %v1307_v45, 0.0  ;;  %v1398_v14 = vsel %vm826_vm14, %v1308_v11, 0.0 }
 0x37f   : > { %v1397_v10 = vadd.f32 %v1396_v32, %v1395_v9 }
 0x381   : > { %v1399_v19 = vadd.f32 %v1398_v14, %v1397_v10 }
 0x384   : > { %v1338_v44 = vpop.permute.xlu0 %1337  ;;  %v1362_v8 = vpop.permute.xlu1 %1361 }
 0x385   : > { %v1381_v31 = vsel %vm239_vm0, %v1338_v44, %v1362_v8 }
 0x386   : > { %v1400_v53 = vsel %vm826_vm14, %v1381_v31, 0.0 }
 0x387   : > { %v1401_v57 = vadd.f32 %v1400_v53, %v1399_v19 }
 0x38c   : > { %v1364_v55 = vpop.permute.xlu0 %1363  ;;  %v1342_v18 = vpop.permute.xlu1 %1341 }
 0x38d   : > { %v1382_v15 = vsel %vm239_vm0, %v1340_v62, %v1364_v55  ;;  %v1383_v23 = vsel %vm239_vm0, %v1342_v18, %v1366_v2 }
 0x38e   : > { %v1402_v28 = vsel %vm826_vm14, %v1382_v15, 0.0  ;;  %v1404_v25 = vsel %vm826_vm14, %v1383_v23, 0.0 }
 0x38f   : > { %v1403_v5 = vadd.f32 %v1402_v28, %v1401_v57 }
 0x391   : > { %v1405_v12 = vadd.f32 %v1404_v25, %v1403_v5 }
 0x3c0   : > { %v777_v35 = vpop.permute.xlu2 %776 }
 0x3c8   : > { %v1368_v42 = vpop.permute.xlu2 %1367 }
 0x3d8   : > { %v801_v46 = vpop.permute.xlu0 %800 }
 0x3d9   : > { %v817_v61 = vsel %vm239_vm0, %v777_v35, %v801_v46 }
 0x3da   : > { %v840_v36 = vsel %vm826_vm14, %v817_v61, 0.0 }
 0x3db   : > { %v841_v21 = vadd.f32 %v840_v36, %v839_v34 }
 0x3dd   : > { %v842_v58 = vrot.slane %v841_v21, 4 }
 0x3df   : > { %v843_v40 = vadd.f32 %v842_v58, %v841_v21 }
 0x3e0   : > { %v1344_v24 = vpop.permute.xlu1 %1343 }
 0x3e1   : > { %v844_v39 = vrot.slane %v843_v40, 2  ;;  %v1384_v59 = vsel %vm239_vm0, %v1344_v24, %v1368_v42 }
 0x3e2   : > { %v1406_v37 = vsel %vm826_vm14, %v1384_v59, 0.0 }
 0x3e3   : > { %v845_v47 = vadd.f32 %v844_v39, %v843_v40  ;;  %v1407_v27 = vadd.f32 %v1406_v37, %v1405_v12 }
 0x3e5   : > { %v846_v13 = vrot.slane %v845_v47, 1  ;;  %v1408_v4 = vrot.slane %v1407_v27, 4 }
 0x3e7   : > { %v847_v1 = vadd.f32 %v846_v13, %v845_v47  ;;  %v1409_v43 = vadd.f32 %v1408_v4, %v1407_v27 }
 0x3e9   : > { %849 = vst.msk [vmem:[%s171_s5] sm:$0x1] %vm848_vm1, %v847_v1  ;;  %v1410_v3 = vrot.slane %v1409_v43, 2 }
 0x3eb   : > { %v1411_v51 = vadd.f32 %v1410_v3, %v1409_v43 }
 0x3ed   : > { %v1412_v17 = vrot.slane %v1411_v51, 1 }
 0x3ef   : > { %v1413_v33 = vadd.f32 %v1412_v17, %v1411_v51 }
 0x3f1   : > { %1578 = vst.msk [vmem:[%s171_s5 + $0x1] sm:$0x1] %vm848_vm1, %v1413_v33 }
 0x3f2 PF: > { %s12_s9 = sadd.s32 1, %s1633_s9  }
 0x3f3   : > { %p9_p4 = scmp.ge.s32.totalorder %s12_s9, 4  }
 0x3f5   :  { %11 = sbr.rel (!%p9_p4) target bundleno = 1 (0x1), region = 64 }

</bundles_post_ra>
